<compile_context>
chip_gen: v5e
topology: v5e:2x2
jax: 0.10.0
libtpu: 0.0.40
codegen_flags: <defaults>
</compile_context>

<pallas_src>
import functools

import numpy as np
import jax
import jax.numpy as jnp
from jax import lax
from jax.experimental import pallas as pl
from jax.experimental.pallas import tpu as pltpu

NEG_SLOPE = 0.2
NEG_INF = -1e30


def _device_flags():
    kind = jax.devices()[0].device_kind.lower()
    is_v5 = "v5" in kind
    is_v6 = "v6" in kind
    is_v7 = "v7" in kind
    use_bf16_exp = is_v6 or is_v7   # bf16 EUP path exists on v6e/v7x only (not v5e)
    return is_v5, is_v6, is_v7, use_bf16_exp


# ----------------------------- Pallas kernel --------------------------------
def _gat_stack_kernel(x_hbm, w_ref, asrc_ref, adst_ref, bias_ref, adj_ref,
                      out_hbm, h_ref, xtb_ref, asrow_ref, ostage_ref,
                      *, adj_resident, use_bf16_exp):
    l = pl.program_id(0)
    t = pl.program_id(1)
    num_layers = pl.num_programs(0)
    tm = ostage_ref.shape[0]

    # One-shot HBM -> VMEM load of the input features: x is read exactly once per
    # call, so it never occupies a (double-buffered) pipelined VMEM block.
    @pl.when((l == 0) & (t == 0))
    def _():
        pltpu.sync_copy(x_hbm, h_ref)

    # Once per layer: project all nodes and compute the lane-major source term.
    @pl.when(t == 0)
    def _():
        xt = jnp.dot(h_ref[...].astype(jnp.bfloat16), w_ref[0],
                     preferred_element_type=jnp.float32)              # (N, H) f32
        # a_src directly as a lane-major (1, N) row via the MXU (no N x H transpose
        # through the XLU): contract the feature axis of both operands.
        asrow_ref[...] = lax.dot_general(
            asrc_ref[0], xt, (((1,), (1,)), ((), ())),
            preferred_element_type=jnp.float32)                       # (1, N)
        xtb_ref[...] = xt.astype(jnp.bfloat16)

    row0 = pl.multiple_of(t * tm, tm)

    # Per-tile recompute of the destination term from the bf16 projection: TM*H of
    # VPU work replaces a (N,1) f32 scratch that lane-pads 128x in VMEM.
    xtile = xtb_ref[pl.ds(row0, tm), :].astype(jnp.float32)           # (TM, H)
    a_dst = jnp.sum(xtile * adst_ref[0], axis=-1, keepdims=True)      # (TM, 1)

    adj_tile = adj_ref[t] if adj_resident else adj_ref[0]             # (TM, N) int8

    # e[i, j] = a_dst[i] + a_src[j] for this dst-row tile; LeakyReLU + adjacency mask.
    e = a_dst + asrow_ref[...]                                        # (TM, N)
    e = jnp.where(e > 0, e, NEG_SLOPE * e)
    e = jnp.where(adj_tile != 0, e, NEG_INF)
    m = jnp.max(e, axis=-1, keepdims=True)

    if use_bf16_exp:
        # v6e / v7x: bf16 EUP exp (~2x throughput); p is bf16 for the MXU anyway,
        # and the (TM, N) temporary is halved. Masked entries still underflow to 0.
        p = jnp.exp((e - m).astype(jnp.bfloat16))
        s = jnp.sum(p.astype(jnp.float32), axis=-1, keepdims=True)
        pm = p
    else:
        # v5e: no bf16 EUP path; keep the exponent in f32.
        p = jnp.exp(e - m)
        s = jnp.sum(p, axis=-1, keepdims=True)
        pm = p.astype(jnp.bfloat16)

    inv = pl.reciprocal(s, approx=True)

    # Normalize AFTER the matmul: a (TM, H) scale instead of a (TM, N) divide.
    o = (jnp.dot(pm, xtb_ref[...], preferred_element_type=jnp.float32) * inv
         ) + bias_ref[0]

    @pl.when(l < num_layers - 1)
    def _():
        # inter-layer ReLU, gated so the last layer skips it entirely
        h_ref[pl.ds(row0, tm), :] = jnp.maximum(o, 0.0)

    # Only the last layer touches HBM: manual per-tile store removes the dead
    # (L-1)*N*H*4-byte writeback a pipelined output block would generate.
    @pl.when(l == num_layers - 1)
    def _():
        ostage_ref[...] = o
        pltpu.sync_copy(ostage_ref, out_hbm.at[pl.ds(row0, tm), :])


def gat_stack(x, w, asrc, adst, bias, adj, *, block_rows=None, adj_resident=None):
    """Run `num_layers` GAT layers fused in a single pallas_call.

    x: (N, H) f32 (padded); w: (L, H, H) bf16; asrc/adst/bias: (L, 1, H) f32;
    adj: (N, N) int8 adjacency mask (adj[dst, src] != 0 => edge src -> dst).
    """
    n, h = x.shape
    num_layers = w.shape[0]
    is_v5, _, is_v7, use_bf16_exp = _device_flags()

    if block_rows is None:
        # v7x has 64 MiB VMEM per TC -> smaller row tiles; 128-MiB parts amortize
        # the ~0.35us/grid-step overhead with bigger tiles.
        block_rows = 256 if is_v7 else 512
    tm = min(block_rows, n)
    assert n % tm == 0 and tm % 16 == 0, "row tile must divide padded N and be %16"
    nt = n // tm
    adj_t = adj.reshape(nt, tm, n)

    if adj_resident is None:
        # Pin the whole adjacency in VMEM when cheap: removes the L*(N/tm)-fold
        # re-read of the dominant HBM stream. Be conservative on v7x (64 MiB).
        budget = (8 << 20) if is_v7 else (24 << 20)
        adj_resident = int(adj.size) <= budget   # int8: size == bytes

    if adj_resident:
        adj_spec = pl.BlockSpec((nt, tm, n), lambda l, t: (0, 0, 0))
    else:
        # 3-deep buffering hides the layer-boundary bubble created by the serial
        # t==0 projection work.
        # TODO(synk): bit-pack adjacency (8 edges/byte) for v5e where the streamed
        # int8 mask is still DMA-exposed at 0.82 TB/s.
        adj_spec = pl.BlockSpec((1, tm, n), lambda l, t: (t, 0, 0),
                                pipeline_mode=pl.Buffered(3))

    bytes_accessed = int(
        x.size * 4 + w.size * 2 + (asrc.size + adst.size + bias.size) * 4
        + (adj.size if adj_resident else adj.size * num_layers) + n * h * 4)
    cost = pl.CostEstimate(
        flops=int(2 * num_layers * (n * h * h + n * n * h + n * h)),
        transcendentals=int(num_layers * n * n),
        bytes_accessed=bytes_accessed,
    )

    # TODO(synk): on v7x, split the dst-row-tile axis across both TensorCores with
    # per-core xt recompute + per-core scratch (core_map / CORE_PARALLEL); today the
    # whole O(N^2) attention runs on one core because xtb/h scratch is shared.
    vmem_limit = (48 << 20) if is_v7 else (96 << 20)

    kernel = functools.partial(_gat_stack_kernel,
                               adj_resident=adj_resident,
                               use_bf16_exp=use_bf16_exp)

    return pl.pallas_call(
        kernel,
        out_shape=jax.ShapeDtypeStruct((n, h), jnp.float32),
        grid_spec=pltpu.PrefetchScalarGridSpec(
            num_scalar_prefetch=0,
            grid=(num_layers, nt),
            in_specs=[
                pl.BlockSpec(memory_space=pl.ANY),                 # x: HBM, read once
                pl.BlockSpec((1, h, h), lambda l, t: (l, 0, 0)),   # W per layer (bf16)
                pl.BlockSpec((1, 1, h), lambda l, t: (l, 0, 0)),   # att_src per layer
                pl.BlockSpec((1, 1, h), lambda l, t: (l, 0, 0)),   # att_dst per layer
                pl.BlockSpec((1, 1, h), lambda l, t: (l, 0, 0)),   # bias per layer
                adj_spec,                                          # int8 adjacency
            ],
            out_specs=pl.BlockSpec(memory_space=pl.ANY),           # manual last-layer DMA
            scratch_shapes=[
                pltpu.VMEM((n, h), jnp.float32),    # resident hidden state (all nodes)
                pltpu.VMEM((n, h), jnp.bfloat16),   # per-layer projection xt (bf16)
                pltpu.VMEM((1, n), jnp.float32),    # a_src row (lane-major)
                pltpu.VMEM((tm, h), jnp.float32),   # output staging tile
            ],
        ),
        compiler_params=pltpu.CompilerParams(
            dimension_semantics=("arbitrary", "arbitrary"),
            vmem_limit_bytes=vmem_limit),
        cost_estimate=cost,
    )(x, w, asrc, adst, bias, adj_t)


# ------------------------------ glue / module --------------------------------
class CustomHeteroMetadata:
    def __init__(self, num_all_nodes, node_types, num_node_types_dict, rel_types):
        self.num_all_nodes = num_all_nodes
        self.node_types = node_types
        self.num_node_types_dict = num_node_types_dict
        self.rel_types = rel_types

    def metadata(self):
        return (self.node_types, self.rel_types)


def _init_gat_params(key, num_layers, hidden):
    kw, ka, kd = jax.random.split(key, 3)
    scale = 1.0 / np.sqrt(hidden)
    return dict(
        # W stored bf16: halves the per-layer weight DMA; matmuls accumulate f32.
        W=(jax.random.normal(kw, (num_layers, hidden, hidden), jnp.float32)
           * scale).astype(jnp.bfloat16),
        asrc=jax.random.normal(ka, (num_layers, 1, hidden), jnp.float32) * scale,
        adst=jax.random.normal(kd, (num_layers, 1, hidden), jnp.float32) * scale,
        bias=jnp.zeros((num_layers, 1, hidden), jnp.float32),
    )


class GNN:
    def __init__(self, metadata, num_layers, hidden_channels, key, block_rows=None):
        self.metadata = metadata
        self.num_layers = num_layers
        self.hidden_channels = hidden_channels
        self.block_rows = block_rows
        k_emb, k_conv = jax.random.split(key)
        self.embeddings = (
            jax.random.normal(k_emb, (metadata.num_all_nodes, hidden_channels),
                              jnp.float32) * 0.02)
        self.convs = {}
        all_rels = list(metadata.rel_types) + [
            ("interaction", "interacts", "node"),
            ("node", "interacts", "interaction"),
        ]
        keys = jax.random.split(k_conv, len(all_rels))
        for rel, k in zip(all_rels, keys):
            self.convs[rel] = _init_gat_params(k, num_layers, hidden_channels)

    def _prepare(self, edge_index):
        """Host-side, data-dependent re-indexing (same dict logic as the torch code)."""
        edge_index = np.asarray(edge_index)
        node_ids_dict = {}
        new_edge_index = []
        for node_id in edge_index.flatten().tolist():
            if node_id not in node_ids_dict:
                node_ids_dict[node_id] = len(node_ids_dict)
            new_edge_index.append(node_ids_dict[node_id])
        unique_ids = np.fromiter(node_ids_dict.keys(), dtype=np.int32)
        new_edge_index = np.asarray(new_edge_index, dtype=np.int32).reshape(2, -1)

        # TODO(synk): torch code does torch.cat(x, dim=-1) giving a 1-D tensor (a bug,
        # GATConv needs (N, C)); we keep the (num_nodes, hidden) stacking instead.
        x = self.embeddings[jnp.asarray(unique_ids)]
        nu = int(x.shape[0])
        h = self.hidden_channels
        n_pad = max(128, ((nu + 127) // 128) * 128)
        x_pad = jnp.zeros((n_pad, h), jnp.float32).at[:nu].set(x)

        # int8 adjacency mask built on-device: only the tiny edge list crosses PCIe.
        src = jnp.asarray(new_edge_index[0], dtype=jnp.int32)
        dst = jnp.asarray(new_edge_index[1], dtype=jnp.int32)
        diag = jnp.arange(n_pad, dtype=jnp.int32)
        adj = jnp.zeros((n_pad, n_pad), jnp.int8)
        adj = adj.at[diag, diag].set(1)          # add_self_loops=True
        adj = adj.at[dst, src].set(1)            # edge src -> dst
        return x_pad, adj, nu

    def forward(self, edge_index_dict):
        # Note: the torch forward has no return statement; we return the result of the
        # last processed relation so the hot path is observable.
        result = None
        for rel_type in self.metadata.rel_types:
            if rel_type not in edge_index_dict:
                continue
            x_pad, adj, nu = self._prepare(edge_index_dict[rel_type])
            p = self.convs[rel_type]
            out_pad = gat_stack(x_pad, p["W"], p["asrc"], p["adst"], p["bias"], adj,
                                block_rows=self.block_rows)
            result = out_pad[:nu]
        return result


# --------------------------- pure-JAX reference ------------------------------
def _gat_stack_ref(x, params, adj, num_layers, use_bf16_exp):
    h = x
    mask = adj != 0
    for l in range(num_layers):
        w = params["W"][l]                       # bf16
        asrc = params["asrc"][l, 0]
        adst = params["adst"][l, 0]
        bias = params["bias"][l, 0]
        xt = jnp.dot(h.astype(jnp.bfloat16), w, preferred_element_type=jnp.float32)
        xtb = xt.astype(jnp.bfloat16)
        a_src = (xt * asrc).sum(-1)
        a_dst = (xtb.astype(jnp.float32) * adst).sum(-1)   # mirrors per-tile recompute
        e = a_dst[:, None] + a_src[None, :]
        e = jnp.where(e > 0, e, NEG_SLOPE * e)
        e = jnp.where(mask, e, NEG_INF)
        m = e.max(-1, keepdims=True)
        if use_bf16_exp:
            p = jnp.exp((e - m).astype(jnp.bfloat16))
            s = p.astype(jnp.float32).sum(-1, keepdims=True)
            pm = p
        else:
            p = jnp.exp(e - m)
            s = p.sum(-1, keepdims=True)
            pm = p.astype(jnp.bfloat16)
        out = jnp.dot(pm, xtb, preferred_element_type=jnp.float32) / s + bias
        h = jnp.maximum(out, 0.0) if l < num_layers - 1 else out
    return h


if __name__ == "__main__":
    key = jax.random.PRNGKey(0)
    metadata = CustomHeteroMetadata(
        num_all_nodes=256,
        node_types=["drug", "protein"],
        num_node_types_dict={"drug": 128, "protein": 128},
        rel_types=[("drug", "binds", "protein"),
                   ("protein", "interacts", "protein")],
    )
    model = GNN(metadata, num_layers=2, hidden_channels=128, key=key, block_rows=128)

    # Relation A: 144 unique nodes (pads to 256 -> two 128-row tiles); ring + chords.
    src_a = np.arange(0, 144, dtype=np.int32)
    dst_a = np.concatenate([np.arange(1, 144), [0]]).astype(np.int32)
    chord_src = np.arange(0, 144, 7, dtype=np.int32)
    chord_dst = ((chord_src * 5 + 3) % 144).astype(np.int32)
    edge_a = np.stack([np.concatenate([src_a, chord_src]),
                       np.concatenate([dst_a, chord_dst])])

    # Relation B: 40 unique nodes (pads to 128 -> single tile), simple ring.
    src_b = np.arange(150, 190, dtype=np.int32)
    dst_b = np.concatenate([np.arange(151, 190), [150]]).astype(np.int32)
    edge_b = np.stack([src_b, dst_b])

    edge_index_dict = {
        ("drug", "binds", "protein"): edge_a,
        ("protein", "interacts", "protein"): edge_b,
    }

    out = model.forward(edge_index_dict)
    out = jax.block_until_ready(out)

    # Correctness: both relations, both adjacency modes (resident + streamed),
    # against a pure-JAX dense GAT reference that mirrors the kernel numerics.
    _, _, _, use_bf16_exp = _device_flags()
    for rel in metadata.rel_types:
        x_pad, adj, nu = model._prepare(edge_index_dict[rel])
        p = model.convs[rel]
        ref = _gat_stack_ref(x_pad, p, adj, model.num_layers, use_bf16_exp)[:nu]
        got_res = gat_stack(x_pad, p["W"], p["asrc"], p["adst"], p["bias"], adj,
                            block_rows=128)[:nu]
        got_str = gat_stack(x_pad, p["W"], p["asrc"], p["adst"], p["bias"], adj,
                            block_rows=128, adj_resident=False)[:nu]
        got_res, got_str = jax.block_until_ready((got_res, got_str))
        assert np.allclose(np.asarray(got_res), np.asarray(ref),
                           atol=2e-3, rtol=5e-2), f"resident-adj mismatch for {rel}"
        assert np.allclose(np.asarray(got_str), np.asarray(ref),
                           atol=2e-3, rtol=5e-2), f"streamed-adj mismatch for {rel}"

    print("KERNEL_OK")
</pallas_src>

<mosaic_0001>
module attributes {stable_mosaic.version = 11 : i64} {
  func.func @_gat_stack_kernel(%arg0: i32, %arg1: i32, %arg2: memref<256x128xf32, #tpu.memory_space<any>>, %arg3: memref<1x128x128xbf16, #tpu.memory_space<vmem>>, %arg4: memref<1x1x128xf32, #tpu.memory_space<vmem>>, %arg5: memref<1x1x128xf32, #tpu.memory_space<vmem>>, %arg6: memref<1x1x128xf32, #tpu.memory_space<vmem>>, %arg7: memref<2x128x256xi8, #tpu.memory_space<vmem>>, %arg8: memref<256x128xf32, #tpu.memory_space<any>>, %arg9: memref<256x128xf32, #tpu.memory_space<vmem>>, %arg10: memref<256x128xbf16, #tpu.memory_space<vmem>>, %arg11: memref<1x256xf32, #tpu.memory_space<vmem>>, %arg12: memref<128x128xf32, #tpu.memory_space<vmem>>) attributes {dimension_semantics = [#tpu.dimension_semantics<arbitrary>, #tpu.dimension_semantics<arbitrary>], iteration_bounds = array<i64: 2, 2>, scalar_prefetch = 0 : i64, scratch_operands = 4 : i64, tpu.core_type = #tpu.core_type<tc>, window_params = [{}, {transform_indices = @transform_1, window_bounds = array<i64: 1, 128, 128>}, {transform_indices = @transform_2, window_bounds = array<i64: 1, 1, 128>}, {transform_indices = @transform_3, window_bounds = array<i64: 1, 1, 128>}, {transform_indices = @transform_4, window_bounds = array<i64: 1, 1, 128>}, {pipeline_mode = #tpu.pipeline_mode<synchronous>, transform_indices = @transform_5, window_bounds = array<i64: 2, 128, 256>}, {}]} {
    %c0_i32 = arith.constant 0 : i32
    %0 = arith.cmpi eq, %arg0, %c0_i32 : i32
    %c0_i32_0 = arith.constant 0 : i32
    %1 = arith.cmpi eq, %arg1, %c0_i32_0 : i32
    %2 = arith.andi %0, %1 : i1
    %3 = arith.extui %2 : i1 to i32
    %c0_i32_1 = arith.constant 0 : i32
    %4 = arith.cmpi ne, %3, %c0_i32_1 : i32
    scf.if %4 {
      "tpu.region"() ({
        %58 = tpu.sem_alloc : memref<!tpu.dma_semaphore, #tpu.memory_space<semaphore_mem>>
        tpu.enqueue_dma source(%arg2 : memref<256x128xf32, #tpu.memory_space<any>>) target(%arg9 : memref<256x128xf32, #tpu.memory_space<vmem>>) target_semaphore(%58 : memref<!tpu.dma_semaphore, #tpu.memory_space<semaphore_mem>>)
        tpu.wait_dma2 semaphore(%58 : memref<!tpu.dma_semaphore, #tpu.memory_space<semaphore_mem>>) src(%arg2 : memref<256x128xf32, #tpu.memory_space<any>>) dst(%arg9 : memref<256x128xf32, #tpu.memory_space<vmem>>)
        tpu.yield
      }) : () -> ()
    } else {
    }
    %c0_i32_2 = arith.constant 0 : i32
    %5 = arith.cmpi eq, %arg1, %c0_i32_2 : i32
    %6 = arith.extui %5 : i1 to i32
    %c0_i32_3 = arith.constant 0 : i32
    %7 = arith.cmpi ne, %6, %c0_i32_3 : i32
    scf.if %7 {
      %c0_25 = arith.constant 0 : index
      %c0_26 = arith.constant 0 : index
      %58 = vector.load %arg9[%c0_25, %c0_26] : memref<256x128xf32, #tpu.memory_space<vmem>>, vector<256x128xf32>
      %59 = arith.truncf %58 : vector<256x128xf32> to vector<256x128xbf16>
      %c0_27 = arith.constant 0 : index
      %c0_28 = arith.constant 0 : index
      %c0_29 = arith.constant 0 : index
      %60 = vector.load %arg3[%c0_27, %c0_28, %c0_29] : memref<1x128x128xbf16, #tpu.memory_space<vmem>>, vector<1x128x128xbf16>
      %61 = vector.shape_cast %60 : vector<1x128x128xbf16> to vector<128x128xbf16>
      %cst_30 = arith.constant dense<0.000000e+00> : vector<256x128xf32>
      %62 = tpu.matmul %59, %61, %cst_30 {dimension_numbers = #tpu.dot_dimension_numbers<[1], [0], [0], [1], [0, 0, 1, 1], [], []>} : vector<256x128xbf16>, vector<128x128xbf16>, vector<256x128xf32> -> vector<256x128xf32>
      %c0_31 = arith.constant 0 : index
      %c0_32 = arith.constant 0 : index
      %c0_33 = arith.constant 0 : index
      %63 = vector.load %arg4[%c0_31, %c0_32, %c0_33] : memref<1x1x128xf32, #tpu.memory_space<vmem>>, vector<1x1x128xf32>
      %64 = vector.shape_cast %63 : vector<1x1x128xf32> to vector<1x128xf32>
      %cst_34 = arith.constant dense<0.000000e+00> : vector<1x256xf32>
      %65 = tpu.matmul %64, %62, %cst_34 {dimension_numbers = #tpu.dot_dimension_numbers<[1], [1], [0], [0], [0, 0, 1, 0], [], []>} : vector<1x128xf32>, vector<256x128xf32>, vector<1x256xf32> -> vector<1x256xf32>
      %c0_35 = arith.constant 0 : index
      %c0_36 = arith.constant 0 : index
      %66 = vector.load %arg11[%c0_35, %c0_36] : memref<1x256xf32, #tpu.memory_space<vmem>>, vector<1x256xf32>
      tpu.vector_store %arg11[%c0_35, %c0_36], %65 {strides = array<i32>} : memref<1x256xf32, #tpu.memory_space<vmem>>, vector<1x256xf32>,
      %67 = arith.truncf %62 : vector<256x128xf32> to vector<256x128xbf16>
      %c0_37 = arith.constant 0 : index
      %c0_38 = arith.constant 0 : index
      %68 = vector.load %arg10[%c0_37, %c0_38] : memref<256x128xbf16, #tpu.memory_space<vmem>>, vector<256x128xbf16>
      tpu.vector_store %arg10[%c0_37, %c0_38], %67 {strides = array<i32>} : memref<256x128xbf16, #tpu.memory_space<vmem>>, vector<256x128xbf16>,
    } else {
    }
    %c128_i32 = arith.constant 128 : i32
    %8 = arith.muli %arg1, %c128_i32 : i32
    %9 = tpu.assume_multiple %8, 128 : i32
    %10 = arith.index_cast %9 : i32 to index
    %c0 = arith.constant 0 : index
    %11 = vector.load %arg10[%10, %c0] : memref<256x128xbf16, #tpu.memory_space<vmem>>, vector<128x128xbf16>
    %12 = arith.extf %11 : vector<128x128xbf16> to vector<128x128xf32>
    %c0_4 = arith.constant 0 : index
    %c0_5 = arith.constant 0 : index
    %c0_6 = arith.constant 0 : index
    %13 = vector.load %arg5[%c0_4, %c0_5, %c0_6] : memref<1x1x128xf32, #tpu.memory_space<vmem>>, vector<1x1x128xf32>
    %14 = vector.shape_cast %13 : vector<1x1x128xf32> to vector<1x128xf32>
    %15 = vector.broadcast %14 : vector<1x128xf32> to vector<128x128xf32>
    %16 = arith.mulf %12, %15 : vector<128x128xf32>
    %cst = arith.constant dense<0.000000e+00> : vector<128xf32>
    %17 = vector.multi_reduction <add>, %16, %cst [1] : vector<128x128xf32> to vector<128xf32>
    %18 = vector.shape_cast %17 : vector<128xf32> to vector<128x1xf32>
    %19 = arith.index_cast %arg1 : i32 to index
    %c0_7 = arith.constant 0 : index
    %c0_8 = arith.constant 0 : index
    %20 = vector.load %arg7[%19, %c0_7, %c0_8] : memref<2x128x256xi8, #tpu.memory_space<vmem>>, vector<1x128x256xi8>
    %21 = vector.shape_cast %20 : vector<1x128x256xi8> to vector<128x256xi8>
    %c0_9 = arith.constant 0 : index
    %c0_10 = arith.constant 0 : index
    %22 = vector.load %arg11[%c0_9, %c0_10] : memref<1x256xf32, #tpu.memory_space<vmem>>, vector<1x256xf32>
    %23 = vector.broadcast %18 : vector<128x1xf32> to vector<128x256xf32>
    %24 = vector.broadcast %22 : vector<1x256xf32> to vector<128x256xf32>
    %25 = arith.addf %23, %24 : vector<128x256xf32>
    %cst_11 = arith.constant 0.000000e+00 : f32
    %26 = vector.broadcast %cst_11 : f32 to vector<128x256xf32>
    %27 = arith.cmpf ogt, %25, %26 : vector<128x256xf32>
    %cst_12 = arith.constant 2.000000e-01 : f32
    %28 = vector.broadcast %cst_12 : f32 to vector<128x256xf32>
    %29 = arith.mulf %28, %25 : vector<128x256xf32>
    %30 = arith.select %27, %25, %29 : vector<128x256xi1>, vector<128x256xf32>
    %c0_i8 = arith.constant 0 : i8
    %31 = vector.broadcast %c0_i8 : i8 to vector<128x256xi8>
    %32 = arith.cmpi ne, %21, %31 : vector<128x256xi8>
    %cst_13 = arith.constant -1.000000e+30 : f32
    %33 = vector.broadcast %cst_13 : f32 to vector<128x256xf32>
    %34 = arith.select %32, %30, %33 : vector<128x256xi1>, vector<128x256xf32>
    %cst_14 = arith.constant dense<0xFF800000> : vector<128xf32>
    %35 = vector.multi_reduction <maximumf>, %34, %cst_14 [1] : vector<128x256xf32> to vector<128xf32>
    %36 = vector.shape_cast %35 : vector<128xf32> to vector<128x1xf32>
    %37 = vector.broadcast %36 : vector<128x1xf32> to vector<128x256xf32>
    %38 = arith.subf %34, %37 : vector<128x256xf32>
    %39 = math.exp %38 : vector<128x256xf32>
    %cst_15 = arith.constant dense<0.000000e+00> : vector<128xf32>
    %40 = vector.multi_reduction <add>, %39, %cst_15 [1] : vector<128x256xf32> to vector<128xf32>
    %41 = vector.shape_cast %40 : vector<128xf32> to vector<128x1xf32>
    %42 = arith.truncf %39 : vector<128x256xf32> to vector<128x256xbf16>
    %43 = tpu.reciprocal %41 {approx = true} : vector<128x1xf32> -> vector<128x1xf32>
    %c0_16 = arith.constant 0 : index
    %c0_17 = arith.constant 0 : index
    %44 = vector.load %arg10[%c0_16, %c0_17] : memref<256x128xbf16, #tpu.memory_space<vmem>>, vector<256x128xbf16>
    %cst_18 = arith.constant dense<0.000000e+00> : vector<128x128xf32>
    %45 = tpu.matmul %42, %44, %cst_18 {dimension_numbers = #tpu.dot_dimension_numbers<[1], [0], [0], [1], [0, 0, 1, 1], [], []>} : vector<128x256xbf16>, vector<256x128xbf16>, vector<128x128xf32> -> vector<128x128xf32>
    %46 = vector.broadcast %43 : vector<128x1xf32> to vector<128x128xf32>
    %47 = arith.mulf %45, %46 : vector<128x128xf32>
    %c0_19 = arith.constant 0 : index
    %c0_20 = arith.constant 0 : index
    %c0_21 = arith.constant 0 : index
    %48 = vector.load %arg6[%c0_19, %c0_20, %c0_21] : memref<1x1x128xf32, #tpu.memory_space<vmem>>, vector<1x1x128xf32>
    %49 = vector.shape_cast %48 : vector<1x1x128xf32> to vector<1x128xf32>
    %50 = vector.broadcast %49 : vector<1x128xf32> to vector<128x128xf32>
    %51 = arith.addf %47, %50 : vector<128x128xf32>
    %c1_i32 = arith.constant 1 : i32
    %52 = arith.cmpi slt, %arg0, %c1_i32 : i32
    %53 = arith.extui %52 : i1 to i32
    %c0_i32_22 = arith.constant 0 : i32
    %54 = arith.cmpi ne, %53, %c0_i32_22 : i32
    scf.if %54 {
      %cst_25 = arith.constant 0.000000e+00 : f32
      %58 = vector.broadcast %cst_25 : f32 to vector<128x128xf32>
      %59 = arith.maximumf %51, %58 : vector<128x128xf32>
      %60 = arith.index_cast %9 : i32 to index
      %c0_26 = arith.constant 0 : index
      %61 = vector.load %arg9[%60, %c0_26] : memref<256x128xf32, #tpu.memory_space<vmem>>, vector<128x128xf32>
      tpu.vector_store %arg9[%60, %c0_26], %59 {strides = array<i32>} : memref<256x128xf32, #tpu.memory_space<vmem>>, vector<128x128xf32>,
    } else {
    }
    %c1_i32_23 = arith.constant 1 : i32
    %55 = arith.cmpi eq, %arg0, %c1_i32_23 : i32
    %56 = arith.extui %55 : i1 to i32
    %c0_i32_24 = arith.constant 0 : i32
    %57 = arith.cmpi ne, %56, %c0_i32_24 : i32
    scf.if %57 {
      %c0_25 = arith.constant 0 : index
      %c0_26 = arith.constant 0 : index
      %58 = vector.load %arg12[%c0_25, %c0_26] : memref<128x128xf32, #tpu.memory_space<vmem>>, vector<128x128xf32>
      tpu.vector_store %arg12[%c0_25, %c0_26], %51 {strides = array<i32>} : memref<128x128xf32, #tpu.memory_space<vmem>>, vector<128x128xf32>,
      "tpu.region"() ({
        %59 = tpu.sem_alloc : memref<!tpu.dma_semaphore, #tpu.memory_space<semaphore_mem>>
        %c0_i32_27 = arith.constant 0 : i32
        %60 = tpu.memref_slice %arg8[%9, %c0_i32_27] : memref<256x128xf32, #tpu.memory_space<any>> -> memref<128x128xf32, #tpu.memory_space<any>>
        tpu.enqueue_dma source(%arg12 : memref<128x128xf32, #tpu.memory_space<vmem>>) target(%60 : memref<128x128xf32, #tpu.memory_space<any>>) target_semaphore(%59 : memref<!tpu.dma_semaphore, #tpu.memory_space<semaphore_mem>>)
        %c0_i32_28 = arith.constant 0 : i32
        %61 = tpu.memref_slice %arg8[%9, %c0_i32_28] : memref<256x128xf32, #tpu.memory_space<any>> -> memref<128x128xf32, #tpu.memory_space<any>>
        tpu.wait_dma2 semaphore(%59 : memref<!tpu.dma_semaphore, #tpu.memory_space<semaphore_mem>>) src(%arg12 : memref<128x128xf32, #tpu.memory_space<vmem>>) dst(%61 : memref<128x128xf32, #tpu.memory_space<any>>)
        tpu.yield
      }) : () -> ()
    } else {
    }
    return
  }
  func.func @transform_1(%arg0: i32, %arg1: i32) -> (i32, i32, i32) {
    %c0_i32 = arith.constant 0 : i32
    %c0_i32_0 = arith.constant 0 : i32
    %c0_i32_1 = arith.constant 0 : i32
    return %arg0, %c0_i32, %c0_i32_0 : i32, i32, i32
  }
  func.func @transform_2(%arg0: i32, %arg1: i32) -> (i32, i32, i32) {
    %c0_i32 = arith.constant 0 : i32
    %c0_i32_0 = arith.constant 0 : i32
    %c0_i32_1 = arith.constant 0 : i32
    return %arg0, %c0_i32, %c0_i32_0 : i32, i32, i32
  }
  func.func @transform_3(%arg0: i32, %arg1: i32) -> (i32, i32, i32) {
    %c0_i32 = arith.constant 0 : i32
    %c0_i32_0 = arith.constant 0 : i32
    %c0_i32_1 = arith.constant 0 : i32
    return %arg0, %c0_i32, %c0_i32_0 : i32, i32, i32
  }
  func.func @transform_4(%arg0: i32, %arg1: i32) -> (i32, i32, i32) {
    %c0_i32 = arith.constant 0 : i32
    %c0_i32_0 = arith.constant 0 : i32
    %c0_i32_1 = arith.constant 0 : i32
    return %arg0, %c0_i32, %c0_i32_0 : i32, i32, i32
  }
  func.func @transform_5(%arg0: i32, %arg1: i32) -> (i32, i32, i32) {
    %c0_i32 = arith.constant 0 : i32
    %c0_i32_0 = arith.constant 0 : i32
    %c0_i32_1 = arith.constant 0 : i32
    %c0_i32_2 = arith.constant 0 : i32
    return %c0_i32, %c0_i32_0, %c0_i32_1 : i32, i32, i32
  }
}

</mosaic_0001>

<bundles_post_ra>
// kernel: tpu_custom_call.1
= control target key start
LH: loop header
LB: loop body
LE: loop exit
PB: predicated region body
PF: predicated region fallthrough
CT: control target
= control target key end

     0   :  { %s3358_s0 = inlined_call_operand.hbm [shape: f32[256,128], index: 0, kind: input, shape index: {}]   ;;  %s3359_s1 = inlined_call_operand.hbm [shape: bf16[2,128,128], index: 1, kind: input, shape index: {}]   ;;  %s3360_s2 = inlined_call_operand.hbm [shape: f32[2,1,128], index: 2, kind: input, shape index: {}]   ;;  %s3361_s3 = inlined_call_operand.vmem [shape: f32[2,1,128], index: 3, kind: input, shape index: {}]   ;;  %s3362_s4 = inlined_call_operand.hbm [shape: f32[2,1,128], index: 4, kind: input, shape index: {}]   ;;  %s3363_s5 = inlined_call_operand.hbm [shape: s8[2,128,256], index: 5, kind: input, shape index: {}]   ;;  %s3364_s6 = inlined_call_operand.hbm [shape: f32[256,128], index: 6, kind: output, shape index: {}]  }
   0x1   :  { %3369 = sst [smem:[#allocation31_spill]] %s3360_s2 }
   0x2   :  { %3370 = sst [smem:[#allocation32_spill]] %s3363_s5 }
   0x3   :  { %11 = vsyncpa [#allocation7], 0 }
   0x4   :  { %13 = vsyncpa [#allocation7 + $0x1], 0 }
   0x5   :  { %14 = vsyncpa [#allocation9], 0 }
   0x6   :  { %16 = vsyncpa [#allocation9 + $0x1], 0 }
   0x7   :  { %17 = vsyncpa [#allocation12], 0  ;;  %s2530_s21 = smov 0   ;;  %s2532_s22 = smov 0  }
   0x8   :  { %s2534_s23 = smov 0   ;;  %s2536_s24 = smov 0  }
   0x9   :  { %s2538_s25 = smov 0   ;;  %s2540_s26 = smov 0  }
   0xa   :  { %s2542_s27 = smov 0   ;;  %s2544_s28 = smov 0  }
   0xb LB: > { %3371 = sst [smem:[#allocation26_spill]] %s2465_s23  ;;  %s29_s29 = sadd.s32 1, %s2477_s26  ;;  %s2485_s28 = sphi %s2544_s28, %s23_s28   ;;  %s2481_s27 = sphi %s2542_s27, %s3426_s27   ;;  %s2477_s26 = sphi %s2540_s26, %s3421_s26   ;;  %s2473_s25 = sphi %s2538_s25, %s3425_s25   ;;  %s2469_s24 = sphi %s2536_s24, %s3420_s24   ;;  %s2465_s23 = sphi %s2534_s23, %s3419_s23   ;;  %s2461_s22 = sphi %s2532_s22, %s3424_s22   ;;  %s2457_s21 = sphi %s2530_s21, %s3423_s21  }
   0xc   : > { %3372 = sst [smem:[#allocation27_spill]] %s2477_s26  ;;  %s32_s30 = sadd.s32 1, %s2481_s27 }
   0xd   : > { %p30_p0 = scmp.ge.s32.totalorder %s29_s29, 2  ;;  %s39_s7 = sadd.s32 1, %s2465_s23 }
   0xe   : > { %p45_p1 = scmp.ne.s32.totalorder %s2465_s23, %s2461_s22  ;;  %p46_p2 = scmp.eq.s32.totalorder %s2485_s28, 0 }
   0xf   : > { %s3428_s29 = smov (%p30_p0, %s29_s29), 0  ;;  %s3430_s30 = smov (!%p30_p0, %s32_s30), %s2481_s27 }
  0x10   : > { %3373 = sst [smem:[#allocation28_spill]] %s3428_s29  ;;  %p47_p3 = por %p46_p2, %p45_p1 }
  0x11   : > { %p52_p4 = scmp.ne.s32.totalorder %s2461_s22, %s2457_s21  ;;  %p34_p5 = scmp.ge.s32.totalorder %s3430_s30, 2 }
  0x12   : > { %p1728_p6 = scmp.lt.s32.totalorder %s2485_s28, 1  ;;  %p2067_p7 = scmp.lt.s32.totalorder %s2485_s28, 4 }
  0x13   : > { %s3432_s30 = smov (%p34_p5, %s3430_s30), 0  ;;  %s2586_s8 = sand.u32 1, %s2465_s23  }
  0x14   : > { %3374 = sst [smem:[#allocation29_spill]] %s3432_s30  ;;  %p2588_p8 = pnand %p2067_p7, %p47_p3 }
  0x15   : > { %s36_s10 = ssub.s32 %s2481_s27, %s3432_s30  ;;  %s174_s11 = sand.u32 1, %s2485_s28  }
  0x16   : > { %p37_p9 = scmp.eq.s32.totalorder %s36_s10, 0  ;;  %s3377_s2 = sld [smem:[#allocation31_spill]] }
  0x17   : > { %s177_s16 = scalar_lea.vmem [#allocation8], %s2586_s8  ;;  %s2603_s19 = scalar_lea.sflag [#allocation9], %s174_s11 }
  0x18   : > { %s2596_s12 = scalar_select %p37_p9, %s2465_s23, %s39_s7  }
  0x19   : > { %s184_s17 = sshll.u32 %s177_s16, 4  ;;  %s3365_s20 = sadd.s32 4294967295, %s2485_s28   ;;  %s185_s17 = int_to_ptr.vmem [resolvable:$true] %s184_s17 }
  0x1a   : > { %3376 = sst [smem:[#allocation30_spill]] %s2596_s12  ;;  %p2611_p10 = scmp.eq.s32.totalorder %s3365_s20, 0 }
  0x1b   : > { %p2065_p11 = scmp.ge.s32.totalorder %s2485_s28, 1  ;;  %s3379_s5 = sld [smem:[#allocation32_spill]] }
  0x1c   : > { %s180_s15 = scalar_lea.hbm %s3377_s2, %s2481_s27  ;;  %p2624_p12 = por %p2611_p10, %p52_p4 }
  0x1d   : > { %s182_s18 = sshll.u32 %s180_s15, 4  ;;  %p2052_p13 = pnand %p2065_p11, %p2611_p10  ;;  %s183_s18 = int_to_ptr.hbm [resolvable:$true] %s182_s18 }
  0x1e   : > { %2061 = dma.hbm_to_vmem [thread:$0]  (!%p2588_p8), %s183_s18, 16, %s185_s17, %s2603_s19  }
  0x1f   : > { %s2487_s15 = smov [#allocation11]   ;;  %s2488_s17 = smov 256  }
  0x20   : > { %s138_s16 = sshll.u32 %s2487_s15, 4  ;;  %s2489_s18 = smov 16   ;;  %s139_s16 = int_to_ptr.vmem [resolvable:$true] %s138_s16 }
  0x21   : > { %s136_s14 = sshll.u32 %s3379_s5, 4  ;;  %s1731_s10 = sshll.u32 %s2586_s8, 6  ;;  %s137_s14 = int_to_ptr.hbm [resolvable:$true] %s136_s14 }
  0x22   : > { %2054 = dma.hbm_to_vmem [thread:$0]  (!%p2052_p13), %s137_s14, 2048, %s139_s16, [#allocation12], %s2488_s17, %s2488_s17, %s2489_s18  }
  0x23   : > { %s1841_s21 = sshll.u32 %s2481_s27, 6  ;;  %s156_s30 = scalar_lea.vmem [#allocation6], %s1731_s10 }
  0x24   : > { %s161_s2 = scalar_lea.hbm %s3359_s1, %s1841_s21  ;;  %s164_s29 = sshll.u32 %s156_s30, 4  ;;  %s165_s29 = int_to_ptr.vmem [resolvable:$true] %s164_s29 }
  0x25   : > { %s162_s5 = sshll.u32 %s161_s2, 4  ;;  %s153_s15 = scalar_lea.sflag [#allocation7], %s2586_s8  ;;  %s163_s5 = int_to_ptr.hbm [resolvable:$true] %s162_s5 }
  0x26   : > { %s2490_s26 = smov 64   ;;  %s2491_s12 = smov 4  }
  0x27   : > { %2058 = dma.hbm_to_vmem [thread:$0]  (!%p2588_p8), %s163_s5, 1024, %s165_s29, %s153_s15, %s2490_s26, %s2490_s26, %s2491_s12  }
  0x28   : > { %s203_s16 = scalar_lea.hbm %s3362_s4, %s2481_s27  ;;  %s200_s18 = scalar_lea.vmem [#allocation10], %s2586_s8 }
  0x29   : > { %s205_s17 = sshll.u32 %s203_s16, 4  ;;  %s207_s20 = sshll.u32 %s200_s18, 4  ;;  %s206_s17 = int_to_ptr.hbm [resolvable:$true] %s205_s17  ;;  %s208_s20 = int_to_ptr.vmem [resolvable:$true] %s207_s20 }
  0x2a   : > { %2064 = dma.hbm_to_vmem [thread:$0]  (!%p2588_p8), %s206_s17, 16, %s208_s20, %s2603_s19  }
  0x2b   : > { %214 = sbr.rel (%p1728_p6) target bundleno = 1105 (0x451), region = 40  ;;  %s2649_s2 = sand.u32 (!%p1728_p6), 1, %s2461_s22  }
  0x2c   : > { %s1736_s5 = sshll.u32 (!%p1728_p6), %s2649_s2, 6  ;;  %s217_s26 = scalar_lea.sflag (!%p1728_p6), [#allocation7], %s2649_s2 }
  0x2d   : > { %s2653_s23 = scalar_lea.vmem (!%p1728_p6), [#allocation6], %s1736_s5 }
  0x30   : > { %2440 = dma.done.wait (%p2624_p12), %s217_s26, 1024  }
  0x31   : > { %2442 = vsyncadd (%p2624_p12), %s217_s26, 4294966272  ;;  %s3381_s29 = sadd.s32 4294967295, %s2485_s28   ;;  %s229_s9 = scalar_lea.vmem [#allocation8], %s2649_s2 }
  0x32   : > { %s226_s30 = sand.u32 1, %s3381_s29  }
  0x33   : > { %s227_s8 = scalar_lea.sflag [#allocation9], %s226_s30 }
  0x34   : > { %2444 = dma.done.wait (%p2624_p12), %s227_s8, 32  }
  0x35   : > { %2446 = vsyncadd (%p2624_p12), %s227_s8, 4294967264  ;;  %s238_s12 = scalar_lea.vmem [#allocation10], %s2649_s2 }
  0x36   : > { %2448 = dma.done.wait (%p2611_p10), [#allocation12], 2048  }
  0x37   : > { %2450 = vsyncadd (%p2611_p10), [#allocation12], 4294965248  ;;  %p275_p0 = scmp.lt.s32.totalorder %s2473_s25, 1  ;;  %p280_p1 = scmp.eq.s32.totalorder %s2473_s25, 0 }
  0x38   : > { %p281_p2 = scmp.eq.s32.totalorder %s2469_s24, 0 }
  0x39   : > { %s2675_s19 = scalar_select %p275_p0, %s2473_s25, 1 }
  0x3a   : > { %p282_p3 = pnand %p281_p2, %p280_p1 }
  0x3b   : > { %s277_s21 = scalar_lea.vmem %s3361_s3, %s2675_s19 }
  0x3c   : > { %285 = sbr.rel (%p282_p3) target bundleno = 70 (0x46), region = 60 }
  0x41   : > { %s293_s7 = sshll.u32 %s3358_s0, 4  ;;  %s2492_s14 = smov [#allocation2]   ;;  %s294_s7 = int_to_ptr.hbm [resolvable:$true] %s293_s7 }
  0x42   : > { %s295_s16 = sshll.u32 %s2492_s14, 4  ;;  %s296_s16 = int_to_ptr.vmem [resolvable:$true] %s295_s16 }
  0x43   : > { %298 = dma.hbm_to_vmem [thread:$0]  %s294_s7, 4096, %s296_s16, [#allocation13] }
  0x44   : > { %2451 = dma.done.wait [#allocation13], 4096 }
  0x45   : > { %2452 = vsyncadd [#allocation13], 4294963200 }
  0x46 PF: > { %p1738_p4 = scmp.ne.s32.totalorder %s2469_s24, 0 }
  0x48   : > { %304 = sbr.rel (%p1738_p4) target bundleno = 512 (0x200), region = 69 }
  0x4d   : > { %v1849_v0 = vld [vmem:[%s2653_s23 + $0x38] sm:$0xff]  ;;  %v1848_v1 = vld [vmem:[%s2653_s23 + $0x30] sm:$0xff]  ;;  %v1847_v2 = vld [vmem:[%s2653_s23 + $0x28] sm:$0xff]  ;;  %vm550_vm0 = vcmask 1040384  }
  0x4e   : > { %2001 = vmatpush.bf16.msra.mxu1 %v1849_v0  ;;  %2003 = vmatpush.bf16.msra.mxu3 %v1849_v0  ;;  %v1846_v3 = vld [vmem:[%s2653_s23 + $0x20] sm:$0xff]  ;;  %v1845_v4 = vld [vmem:[%s2653_s23 + $0x18] sm:$0xff]  ;;  %v1844_v5 = vld [vmem:[%s2653_s23 + $0x10] sm:$0xff] }
  0x4f   : > { %2002 = vmatpush.bf16.msra.mxu2 %v1849_v0  ;;  %417 = vmatpush.bf16.msra.mxu0 %v1849_v0  ;;  %v1843_v6 = vld [vmem:[%s2653_s23 + $0x8] sm:$0xff]  ;;  %v1842_v7 = vld [vmem:[%s2653_s23] sm:$0xff]  ;;  %v312_v9 = vld [vmem:[#allocation2 + $0x38] sm:$0xff] }
  0x50   : > { %v311_v8 = vld [vmem:[#allocation2 + $0x30] sm:$0xff]  ;;  %v328_v11 = vld [vmem:[#allocation2 + $0xb8] sm:$0xff]  ;;  %v305_v17 = vld [vmem:[#allocation2] sm:$0xff] }
  0x51   : > { %v327_v10 = vld [vmem:[#allocation2 + $0xb0] sm:$0xff]  ;;  %v340_v12 = vpack.c.bf16 %v312_v9, %v311_v8  ;;  %v320_v15 = vld [vmem:[#allocation2 + $0x78] sm:$0xff]  ;;  %v306_v18 = vld [vmem:[#allocation2 + $0x8] sm:$0xff] }
  0x52   : > { %2004 = vmatpush.bf16.msra.mxu1 %v1848_v1  ;;  %2006 = vmatpush.bf16.msra.mxu3 %v1848_v1  ;;  %v348_v13 = vpack.c.bf16 %v328_v11, %v327_v10  ;;  %v319_v14 = vld [vmem:[#allocation2 + $0x70] sm:$0xff]  ;;  %v337_v19 = vpack.c.bf16 %v306_v18, %v305_v17  ;;  %v313_v20 = vld [vmem:[#allocation2 + $0x40] sm:$0xff]  ;;  %v314_v21 = vld [vmem:[#allocation2 + $0x48] sm:$0xff] }
  0x53   : > { %2005 = vmatpush.bf16.msra.mxu2 %v1848_v1  ;;  %418 = vmatpush.bf16.msra.mxu0 %v1848_v1  ;;  %v344_v16 = vpack.c.bf16 %v320_v15, %v319_v14  ;;  %v329_v22 = vld [vmem:[#allocation2 + $0xc0] sm:$0xff]  ;;  %v330_v23 = vld [vmem:[#allocation2 + $0xc8] sm:$0xff]  ;;  %v341_v24 = vpack.c.bf16 %v314_v21, %v313_v20  ;;  %v307_v26 = vld [vmem:[#allocation2 + $0x10] sm:$0xff] }
  0x54   : > { %v349_v25 = vpack.c.bf16 %v330_v23, %v329_v22  ;;  %v308_v27 = vld [vmem:[#allocation2 + $0x18] sm:$0xff]  ;;  %v321_v28 = vld [vmem:[#allocation2 + $0x80] sm:$0xff]  ;;  %v322_v30 = vld [vmem:[#allocation2 + $0x88] sm:$0xff] }
  0x55   : > { %v338_v29 = vpack.c.bf16 %v308_v27, %v307_v26  ;;  %v345_v31 = vpack.c.bf16 %v322_v30, %v321_v28  ;;  %v315_v32 = vld [vmem:[#allocation2 + $0x50] sm:$0xff]  ;;  %v316_v33 = vld [vmem:[#allocation2 + $0x58] sm:$0xff]  ;;  %v309_v38 = vld [vmem:[#allocation2 + $0x20] sm:$0xff] }
  0x56   : > { %2007 = vmatpush.bf16.msra.mxu1 %v1847_v2  ;;  %2009 = vmatpush.bf16.msra.mxu3 %v1847_v2  ;;  %v331_v34 = vld [vmem:[#allocation2 + $0xd0] sm:$0xff]  ;;  %v332_v35 = vld [vmem:[#allocation2 + $0xd8] sm:$0xff]  ;;  %v342_v36 = vpack.c.bf16 %v316_v33, %v315_v32  ;;  %v310_v39 = vld [vmem:[#allocation2 + $0x28] sm:$0xff] }
  0x57   : > { %2008 = vmatpush.bf16.msra.mxu2 %v1847_v2  ;;  %419 = vmatpush.bf16.msra.mxu0 %v1847_v2  ;;  %v350_v37 = vpack.c.bf16 %v332_v35, %v331_v34  ;;  %v323_v40 = vld [vmem:[#allocation2 + $0x90] sm:$0xff]  ;;  %v339_v41 = vpack.c.bf16 %v310_v39, %v309_v38  ;;  %v324_v42 = vld [vmem:[#allocation2 + $0x98] sm:$0xff]  ;;  %v317_v44 = vld [vmem:[#allocation2 + $0x60] sm:$0xff] }
  0x58   : > { %v346_v43 = vpack.c.bf16 %v324_v42, %v323_v40  ;;  %v318_v45 = vld [vmem:[#allocation2 + $0x68] sm:$0xff]  ;;  %v333_v46 = vld [vmem:[#allocation2 + $0xe0] sm:$0xff]  ;;  %v335_v53 = vld [vmem:[#allocation2 + $0xf0] sm:$0xff] }
  0x59   : > { %v334_v47 = vld [vmem:[#allocation2 + $0xe8] sm:$0xff]  ;;  %v343_v48 = vpack.c.bf16 %v318_v45, %v317_v44  ;;  %v325_v50 = vld [vmem:[#allocation2 + $0xa0] sm:$0xff]  ;;  %v336_v54 = vld [vmem:[#allocation2 + $0xf8] sm:$0xff] }
  0x5a   : > { %2010 = vmatpush.bf16.msra.mxu1 %v1846_v3  ;;  %2012 = vmatpush.bf16.msra.mxu3 %v1846_v3  ;;  %v351_v49 = vpack.c.bf16 %v334_v47, %v333_v46  ;;  %v326_v51 = vld [vmem:[#allocation2 + $0xa8] sm:$0xff]  ;;  %v352_v55 = vpack.c.bf16 %v336_v54, %v335_v53  ;;  %v506_v40 = vld [vmem:[%s229_s9] sm:$0x1] }
  0x5b   : > { %2011 = vmatpush.bf16.msra.mxu2 %v1846_v3  ;;  %420 = vmatpush.bf16.msra.mxu0 %v1846_v3  ;;  %v347_v52 = vpack.c.bf16 %v326_v51, %v325_v50 }
  0x5e   : > { %2013 = vmatpush.bf16.msra.mxu1 %v1845_v4  ;;  %2015 = vmatpush.bf16.msra.mxu3 %v1845_v4 }
  0x5f   : > { %2014 = vmatpush.bf16.msra.mxu2 %v1845_v4  ;;  %421 = vmatpush.bf16.msra.mxu0 %v1845_v4 }
  0x62   : > { %2016 = vmatpush.bf16.msra.mxu1 %v1844_v5  ;;  %2018 = vmatpush.bf16.msra.mxu3 %v1844_v5 }
  0x63   : > { %2017 = vmatpush.bf16.msra.mxu2 %v1844_v5  ;;  %422 = vmatpush.bf16.msra.mxu0 %v1844_v5 }
  0x66   : > { %2019 = vmatpush.bf16.msra.mxu1 %v1843_v6  ;;  %2021 = vmatpush.bf16.msra.mxu3 %v1843_v6 }
  0x67   : > { %2020 = vmatpush.bf16.msra.mxu2 %v1843_v6  ;;  %423 = vmatpush.bf16.msra.mxu0 %v1843_v6 }
  0x6a   : > { %2022 = vmatpush.bf16.msra.mxu1 %v1842_v7  ;;  %2024 = vmatpush.bf16.msra.mxu3 %v1842_v7 }
  0x6b   : > { %2023 = vmatpush.bf16.msra.mxu2 %v1842_v7  ;;  %424 = vmatpush.bf16.msra.mxu0 %v1842_v7 }
  0x6d   : > { %440 = vmatmul.bf16.vlgmr.msra.gmra.mxu1 %v340_v12  ;;  %480 = vmatmul.bf16.vlgmr.msra.gmra.mxu3 %v348_v13 }
  0x6e   : > { %460 = vmatmul.bf16.vlgmr.msra.gmra.mxu2 %v344_v16  ;;  %425 = vmatmul.bf16.vlgmr.msra.gmra.mxu0 %v337_v19 }
  0x7d   : > { %445 = vmatmul.bf16.gmra.mxu1 %v341_v24  ;;  %485 = vmatmul.bf16.gmra.mxu3 %v349_v25 }
  0x7e   : > { %430 = vmatmul.bf16.gmra.mxu0 %v338_v29  ;;  %465 = vmatmul.bf16.gmra.mxu2 %v345_v31 }
  0x8d   : > { %450 = vmatmul.bf16.gmra.mxu1 %v342_v36  ;;  %490 = vmatmul.bf16.gmra.mxu3 %v350_v37 }
  0x8e   : > { %435 = vmatmul.bf16.gmra.mxu0 %v339_v41  ;;  %470 = vmatmul.bf16.gmra.mxu2 %v346_v43  ;;  %v553_v41 = vlaneseq }
  0x90   : > { %vm555_vm1 = vcmp.lt.s32.totalorder %v553_v41, 256 }
  0x9d   : > { %455 = vmatmul.bf16.gmra.mxu1 %v343_v48  ;;  %495 = vmatmul.bf16.gmra.mxu3 %v351_v49 }
  0x9e   : > { %475 = vmatmul.bf16.gmra.mxu2 %v347_v52 }
  0xad   : > { %500 = vmatmul.bf16.gmra.mxu3 %v352_v55 }
  0xea   : > { %v2693_v56 = vpop.f32.mrf.mxu1 }
  0xeb   : > { %v2705_v0 = vpop.f32.mrf.mxu0 }
  0xf0   : > { %v2695_v57 = vpop.f32.mrf.mxu3 }
  0xf1   : > { %v461_v59 = vpop.f32.mrf.mxu2 }
  0xf2   : > { %v2697_v58 = vpop.f32.mrf.mxu1 }
  0xf3   : > { %v1885_v60 = vpack.c.bf16 %v2697_v58, %v2693_v56  ;;  %v2709_v5 = vpop.f32.mrf.mxu0 }
  0xf4   : > { %v1870_v7 = vpack.c.bf16 %v2709_v5, %v2705_v0 }
  0xf5   : > { %1981 = vst [vmem:[#allocation3 + $0x18] sm:$0xff] %v1885_v60  }
  0xf6   : > { %1871 = vst [vmem:[#allocation3] sm:$0xff] %v1870_v7  }
  0xf8   : > { %v2701_v61 = vpop.f32.mrf.mxu3 }
  0xf9   : > { %v1925_v62 = vpack.c.bf16 %v2701_v61, %v2695_v57  ;;  %v463_v1 = vpop.f32.mrf.mxu2 }
  0xfa   : > { %v446_v63 = vpop.f32.mrf.mxu1  ;;  %v1905_v2 = vpack.c.bf16 %v463_v1, %v461_v59  ;;  %507 = vmatpush.xpose.msrb.mxu1 %v463_v1 }
  0xfb   : > { %1989 = vst [vmem:[#allocation3 + $0x58] sm:$0xff] %v1925_v62   ;;  %v431_v11 = vpop.f32.mrf.mxu0 }
  0xfc   : > { %1985 = vst [vmem:[#allocation3 + $0x38] sm:$0xff] %v1905_v2  }
  0xfe   : > { %508 = vmatpush.xpose.msrb.mxu1 %v461_v59 }
 0x100   : > { %v2707_v3 = vpop.f32.mrf.mxu3 }
 0x101   : > { %v2714_v12 = vpop.f32.mrf.mxu2 }
 0x102   : > { %v448_v4 = vpop.f32.mrf.mxu1 }
 0x103   : > { %v1890_v6 = vpack.c.bf16 %v448_v4, %v446_v63  ;;  %v433_v15 = vpop.f32.mrf.mxu0 }
 0x104   : > { %v1875_v17 = vpack.c.bf16 %v433_v15, %v431_v11 }
 0x105   : > { %1982 = vst [vmem:[#allocation3 + $0x20] sm:$0xff] %v1890_v6  }
 0x106   : > { %1979 = vst [vmem:[#allocation3 + $0x8] sm:$0xff] %v1875_v17  }
 0x108   : > { %v488_v8 = vpop.f32.mrf.mxu3 }
 0x109   : > { %v1930_v9 = vpack.c.bf16 %v488_v8, %v2707_v3  ;;  %v468_v18 = vpop.f32.mrf.mxu2 }
 0x10a   : > { %v451_v10 = vpop.f32.mrf.mxu1  ;;  %v1910_v20 = vpack.c.bf16 %v468_v18, %v2714_v12 }
 0x10b   : > { %1990 = vst [vmem:[#allocation3 + $0x60] sm:$0xff] %v1930_v9   ;;  %v436_v23 = vpop.f32.mrf.mxu0 }
 0x10c   : > { %1986 = vst [vmem:[#allocation3 + $0x40] sm:$0xff] %v1910_v20  }
 0x110   : > { %v491_v13 = vpop.f32.mrf.mxu3 }
 0x111   : > { %v471_v24 = vpop.f32.mrf.mxu2 }
 0x112   : > { %v453_v14 = vpop.f32.mrf.mxu1 }
 0x113   : > { %v1895_v16 = vpack.c.bf16 %v453_v14, %v451_v10  ;;  %v438_v27 = vpop.f32.mrf.mxu0 }
 0x114   : > { %v1880_v29 = vpack.c.bf16 %v438_v27, %v436_v23 }
 0x115   : > { %1983 = vst [vmem:[#allocation3 + $0x28] sm:$0xff] %v1895_v16  }
 0x116   : > { %1980 = vst [vmem:[#allocation3 + $0x10] sm:$0xff] %v1880_v29  }
 0x118   : > { %v493_v19 = vpop.f32.mrf.mxu3 }
 0x119   : > { %v1935_v21 = vpack.c.bf16 %v493_v19, %v491_v13  ;;  %v473_v30 = vpop.f32.mrf.mxu2 }
 0x11a   : > { %v456_v22 = vpop.f32.mrf.mxu1  ;;  %v1915_v32 = vpack.c.bf16 %v473_v30, %v471_v24 }
 0x11b   : > { %1991 = vst [vmem:[#allocation3 + $0x68] sm:$0xff] %v1935_v21  }
 0x11c   : > { %1987 = vst [vmem:[#allocation3 + $0x48] sm:$0xff] %v1915_v32  }
 0x120   : > { %v496_v25 = vpop.f32.mrf.mxu3 }
 0x121   : > { %v476_v34 = vpop.f32.mrf.mxu2 }
 0x122   : > { %v458_v26 = vpop.f32.mrf.mxu1 }
 0x123   : > { %v1900_v28 = vpack.c.bf16 %v458_v26, %v456_v22  ;;  %509 = vmatpush.xpose.msrb.mxu1 %v458_v26 }
 0x125   : > { %1984 = vst [vmem:[#allocation3 + $0x30] sm:$0xff] %v1900_v28  }
 0x127   : > { %510 = vmatpush.xpose.msrb.mxu1 %v456_v22 }
 0x128   : > { %v498_v31 = vpop.f32.mrf.mxu3 }
 0x129   : > { %v1940_v33 = vpack.c.bf16 %v498_v31, %v496_v25  ;;  %v478_v36 = vpop.f32.mrf.mxu2 }
 0x12a   : > { %v1920_v38 = vpack.c.bf16 %v478_v36, %v476_v34 }
 0x12b   : > { %1992 = vst [vmem:[#allocation3 + $0x70] sm:$0xff] %v1940_v33   ;;  %511 = vmatpush.xpose.msrb.mxu1 %v453_v14 }
 0x12c   : > { %1988 = vst [vmem:[#allocation3 + $0x50] sm:$0xff] %v1920_v38  }
 0x12f   : > { %512 = vmatpush.xpose.msrb.mxu1 %v451_v10 }
 0x130   : > { %v501_v35 = vpop.f32.mrf.mxu3 }
 0x133   : > { %513 = vmatpush.xpose.msrb.mxu1 %v448_v4 }
 0x137   : > { %514 = vmatpush.xpose.msrb.mxu1 %v446_v63 }
 0x138   : > { %v503_v37 = vpop.f32.mrf.mxu3 }
 0x139   : > { %v1945_v39 = vpack.c.bf16 %v503_v37, %v501_v35  ;;  %527 = vmatpush.xpose.msrb.mxu2 %v503_v37 }
 0x13b   : > { %1993 = vst [vmem:[#allocation3 + $0x78] sm:$0xff] %v1945_v39   ;;  %515 = vmatpush.xpose.msrb.mxu1 %v2697_v58 }
 0x13d   : > { %528 = vmatpush.xpose.msrb.mxu2 %v501_v35 }
 0x13f   : > { %516 = vmatpush.xpose.msrb.mxu1 %v2693_v56 }
 0x141   : > { %529 = vmatpush.xpose.msrb.mxu2 %v498_v31 }
 0x143   : > { %517 = vmatpush.xpose.msrb.mxu1 %v438_v27 }
 0x145   : > { %530 = vmatpush.xpose.msrb.mxu2 %v496_v25 }
 0x147   : > { %518 = vmatpush.xpose.msrb.mxu1 %v436_v23 }
 0x149   : > { %531 = vmatpush.xpose.msrb.mxu2 %v493_v19 }
 0x14b   : > { %519 = vmatpush.xpose.msrb.mxu1 %v433_v15 }
 0x14d   : > { %532 = vmatpush.xpose.msrb.mxu2 %v491_v13 }
 0x14f   : > { %520 = vmatpush.xpose.msrb.mxu1 %v431_v11 }
 0x151   : > { %533 = vmatpush.xpose.msrb.mxu2 %v488_v8 }
 0x153   : > { %521 = vmatpush.xpose.msrb.mxu1 %v2709_v5 }
 0x155   : > { %534 = vmatpush.xpose.msrb.mxu2 %v2707_v3 }
 0x157   : > { %522 = vmatpush.xpose.msrb.mxu1 %v2705_v0 }
 0x159   : > { %535 = vmatpush.xpose.msrb.mxu2 %v2701_v61 }
 0x15a   : > { %523 = vmatmul.f32.vlgmr.msrb.gmra.mxu1 %v506_v40 }
 0x15d   : > { %536 = vmatpush.xpose.msrb.mxu2 %v2695_v57 }
 0x161   : > { %537 = vmatpush.xpose.msrb.mxu2 %v478_v36 }
 0x165   : > { %538 = vmatpush.xpose.msrb.mxu2 %v476_v34 }
 0x169   : > { %539 = vmatpush.xpose.msrb.mxu2 %v473_v30 }
 0x16d   : > { %540 = vmatpush.xpose.msrb.mxu2 %v471_v24 }
 0x171   : > { %541 = vmatpush.xpose.msrb.mxu2 %v468_v18 }
 0x175   : > { %542 = vmatpush.xpose.msrb.mxu2 %v2714_v12 }
 0x178   : > { %543 = vmatmul.f32.vlgmr.msrb.gmra.mxu2 %v506_v40 }
 0x1d7   : > { %v524_v43 = vpop.f32.mrf.mxu1 }
 0x1fb   : > { %v544_v42 = vpop.f32.mrf.mxu2 }
 0x1fc   : > { %v549_v44 = vrot.slane %v544_v42, 7 }
 0x1fe   : > { %v551_v45 = vsel %vm550_vm0, %v524_v43, %v549_v44 }
 0x1ff   : > { %557 = vst.msk [vmem:[#allocation4] sm:$0x3] %vm555_vm1, %v551_v45 }
 0x200 PF: > { %s2728_s17 = sshll.u32 %s2469_s24, 7  ;;  %v2736_v46 = vld [vmem:[%s277_s21] ss:$0 sm:$0xff]  ;;  %s1850_s29 = sshll.u32 %s2469_s24, 6  ;;  %v2493_v23 = vmov 0  }
 0x201   : > { %s623_s18 = sshra.s32 %s2728_s17, 3  ;;  %s2767_s30 = scalar_lea.vmem [#allocation11], %s1850_s29 }
 0x202   : > { %s1772_s20 = sshll.u32 %s623_s18, 2  ;;  %v718_v21 = vld [vmem:[%s2767_s30 + $0x20] sm:$0xff]  ;;  %v719_v22 = vld [vmem:[%s2767_s30 + $0x28] sm:$0xff]  ;;  %p1839_p5 = scmp.ge.s32.totalorder %s2473_s25, 1 }
 0x203   : > { %s2738_s23 = scalar_lea.vmem [#allocation3], %s1772_s20  ;;  %vm860_vm2 = vnez %v718_v21  ;;  %vm861_vm3 = vnez %v719_v22  ;;  %v714_v26 = vld [vmem:[%s2767_s30] sm:$0xff]  ;;  %v715_v27 = vld [vmem:[%s2767_s30 + $0x8] sm:$0xff]  ;;  %s1570_s24 = scalar_lea.vmem (!%p1839_p5), [#allocation2], %s2728_s17 }
 0x204   : > { %v1997_v47 = vld [vmem:[%s2738_s23 + $0x20] sm:$0xff]   ;;  %v1998_v49 = vld [vmem:[%s2738_s23 + $0x28] sm:$0xff]   ;;  %v1999_v0 = vld [vmem:[%s2738_s23 + $0x30] sm:$0xff]   ;;  %v868_v24 = vsel %vm860_vm2, 16843009, %v2493_v23  ;;  %vm856_vm4 = vnez %v714_v26  ;;  %vm857_vm5 = vnez %v715_v27 }
 0x205   : > { %v1948_v48 = vld [vmem:[%s2738_s23] sm:$0xff]   ;;  %v1965_v50 = vunpack.c.l.bf16 %v1997_v47  ;;  %v1969_v52 = vunpack.c.l.bf16 %v1998_v49  ;;  %v1966_v56 = vunpack.c.h.bf16 %v1997_v47  ;;  %v1970_v58 = vunpack.c.h.bf16 %v1998_v49  ;;  %v1994_v61 = vld [vmem:[%s2738_s23 + $0x8] sm:$0xff]   ;;  %v1995_v6 = vld [vmem:[%s2738_s23 + $0x10] sm:$0xff]  }
 0x206   : > { %v1949_v51 = vunpack.c.l.bf16 %v1948_v48  ;;  %v1950_v57 = vunpack.c.h.bf16 %v1948_v48  ;;  %v1953_v63 = vunpack.c.l.bf16 %v1994_v61  ;;  %v1954_v1 = vunpack.c.h.bf16 %v1994_v61  ;;  %v2000_v12 = vld [vmem:[%s2738_s23 + $0x38] sm:$0xff]  }
 0x207   : > { %v671_v53 = vmul.f32 %v2736_v46, %v1965_v50  ;;  %v673_v55 = vmul.f32 %v2736_v46, %v1969_v52  ;;  %v672_v59 = vmul.f32 %v2736_v46, %v1966_v56  ;;  %v674_v62 = vmul.f32 %v2736_v46, %v1970_v58  ;;  %v2762_v18 = vld [vmem:[%s2738_s23 + $0x18] sm:$0xff]   ;;  %v720_v52 = vld [vmem:[%s2767_s30 + $0x30] sm:$0xff] }
 0x208   : > { %v663_v54 = vmul.f32 %v2736_v46, %v1949_v51  ;;  %v664_v60 = vmul.f32 %v2736_v46, %v1950_v57  ;;  %v1973_v2 = vunpack.c.l.bf16 %v1999_v0  ;;  %v665_v3 = vmul.f32 %v2736_v46, %v1953_v63 }
 0x209   : > { %695 = vadd.xlane.f32.xlu0 %v671_v53  ;;  %699 = vadd.xlane.f32.xlu2 %v673_v55  ;;  %v666_v4 = vmul.f32 %v2736_v46, %v1954_v1  ;;  %v1974_v7 = vunpack.c.h.bf16 %v1999_v0  ;;  %v1957_v8 = vunpack.c.l.bf16 %v1995_v6  ;;  %v1958_v9 = vunpack.c.h.bf16 %v1995_v6  ;;  %v721_v53 = vld [vmem:[%s2767_s30 + $0x38] sm:$0xff]  ;;  %v722_v55 = vld [vmem:[#allocation4] sm:$0x3] }
 0x20a   : > { %679 = vadd.xlane.f32.xlu1 %v663_v54  ;;  %v675_v5 = vmul.f32 %v2736_v46, %v1973_v2  ;;  %v1977_v14 = vunpack.c.l.bf16 %v2000_v12  ;;  %v1978_v15 = vunpack.c.h.bf16 %v2000_v12  ;;  %v1961_v19 = vunpack.c.l.bf16 %v2762_v18 }
 0x20b   : > { %v676_v10 = vmul.f32 %v2736_v46, %v1974_v7  ;;  %v667_v11 = vmul.f32 %v2736_v46, %v1957_v8  ;;  %v668_v13 = vmul.f32 %v2736_v46, %v1958_v9  ;;  %v869_v25 = vsel %vm861_vm3, 16843009, %v2493_v23 }
 0x20c   : > { %v677_v16 = vmul.f32 %v2736_v46, %v1977_v14  ;;  %v678_v17 = vmul.f32 %v2736_v46, %v1978_v15  ;;  %v669_v20 = vmul.f32 %v2736_v46, %v1961_v19  ;;  %v888_v28 = vunpack.c.0.s8 %v868_v24 }
 0x20d   : > { %v889_v29 = vunpack.c.0.s8 %v869_v25  ;;  %v2776_v30 = vsel %vm856_vm4, 16843009, %v2493_v23  ;;  %v865_v31 = vsel %vm857_vm5, 16843009, %v2493_v23  ;;  %v890_v32 = vunpack.c.1.s8 %v868_v24 }
 0x20e   : > { %v891_v33 = vunpack.c.1.s8 %v869_v25  ;;  %v874_v35 = vunpack.c.1.s8 %v2776_v30  ;;  %v875_v36 = vunpack.c.1.s8 %v865_v31  ;;  %v892_v39 = vunpack.c.2.s8 %v868_v24 }
 0x20f   : > { %v920_v34 = vpack.c.b16 %v889_v29, %v888_v28  ;;  %v893_v41 = vunpack.c.2.s8 %v869_v25  ;;  %v872_v42 = vunpack.c.0.s8 %v2776_v30  ;;  %v873_v43 = vunpack.c.0.s8 %v865_v31 }
 0x210   : > { %v922_v37 = vpack.c.b16 %v891_v33, %v890_v32  ;;  %v906_v40 = vpack.c.b16 %v875_v36, %v874_v35  ;;  %v876_v47 = vunpack.c.2.s8 %v2776_v30  ;;  %v877_v49 = vunpack.c.2.s8 %v865_v31 }
 0x211   : > { %697 = vadd.xlane.f32.xlu0 %v672_v59  ;;  %701 = vadd.xlane.f32.xlu2 %v674_v62  ;;  %v921_v38 = vpack.c.b8 %v920_v34, %v920_v34  ;;  %v924_v45 = vpack.c.b16 %v893_v41, %v892_v39  ;;  %v904_v48 = vpack.c.b16 %v873_v43, %v872_v42  ;;  %v894_v59 = vunpack.c.3.s8 %v868_v24 }
 0x212   : > { %681 = vadd.xlane.f32.xlu1 %v664_v60  ;;  %v923_v44 = vpack.c.b8 %v922_v37, %v922_v37  ;;  %v907_v50 = vpack.c.b8 %v906_v40, %v906_v40  ;;  %v908_v54 = vpack.c.b16 %v877_v49, %v876_v47  ;;  %vm862_vm7 = vnez %v720_v52 }
 0x213   : > { %vm944_vm6 = vnez %v921_v38  ;;  %v925_v51 = vpack.c.b8 %v924_v45, %v924_v45  ;;  %v905_v57 = vpack.c.b8 %v904_v48, %v904_v48  ;;  %vm863_vm9 = vnez %v721_v53 }
 0x214   : > { %v960_v56 = vsel %vm944_vm6, 16843009, %v2493_v23  ;;  %vm945_vm8 = vnez %v923_v44  ;;  %v909_v58 = vpack.c.b8 %v908_v54, %v908_v54  ;;  %v2786_v60 = vsel %vm862_vm7, 16843009, %v2493_v23 }
 0x215   : > { %vm946_vm10 = vnez %v925_v51  ;;  %vm937_vm11 = vnez %v907_v50  ;;  %v895_v61 = vunpack.c.3.s8 %v869_v25  ;;  %v2788_v62 = vperm.slane %v722_v55, 0 }
 0x216   : > { %v984_v63 = vunpack.c.0.s8 %v960_v56  ;;  %v985_v0 = vunpack.c.1.s8 %v960_v56  ;;  %v2791_v1 = vsel %vm863_vm9, 16843009, %v2493_v23  ;;  %v961_v2 = vsel %vm945_vm8, 16843009, %v2493_v23 }
 0x217   : > { %v2796_v6 = vperm.slane %v722_v55, 1  ;;  %v953_v7 = vsel %vm937_vm11, 16843009, %v2493_v23  ;;  %vm936_vm12 = vnez %v905_v57  ;;  %vm2799_vm13 = vnez %v909_v58 }
 0x218   : > { %v879_v12 = vunpack.c.3.s8 %v865_v31  ;;  %v986_v14 = vunpack.c.0.s8 %v961_v2  ;;  %vm2806_vm14 = vcmp.ne.s32.totalorder %v984_v63, 0  ;;  %vm2810_vm15 = vcmp.ne.s32.totalorder %v985_v0, 0 }
 0x219   : > { %683 = vadd.xlane.f32.xlu0 %v665_v3  ;;  %703 = vadd.xlane.f32.xlu2 %v675_v5  ;;  %v962_v3 = vsel %vm946_vm10, 16843009, %v2493_v23  ;;  %v898_v5 = vunpack.c.1.s8 %v2786_v60  ;;  %v987_v24 = vunpack.c.1.s8 %v961_v2  ;;  %v970_v25 = vunpack.c.0.s8 %v953_v7 }
 0x21a   : > { %685 = vadd.xlane.f32.xlu1 %v666_v4  ;;  %v926_v4 = vpack.c.b16 %v895_v61, %v894_v59  ;;  %v988_v15 = vunpack.c.0.s8 %v962_v3  ;;  %v896_v29 = vunpack.c.0.s8 %v2786_v60  ;;  %v971_v32 = vunpack.c.1.s8 %v953_v7 }
 0x21b   : > { %v900_v42 = vunpack.c.2.s8 %v2786_v60  ;;  %v901_v52 = vunpack.c.2.s8 %v2791_v1  ;;  %vm2856_vm5 = vcmp.ne.s32.totalorder %v986_v14, 0  ;;  %vm2860_vm6 = vcmp.ne.s32.totalorder %v987_v24, 0 }
 0x21c   : > { %v927_v9 = vpack.c.b8 %v926_v4, %v926_v4  ;;  %vm2828_vm1 = vcmp.ne.s32.totalorder %v988_v15, 0  ;;  %vm2864_vm7 = vcmp.ne.s32.totalorder %v970_v25, 0  ;;  %vm2874_vm10 = vcmp.ne.s32.totalorder %v971_v32, 0 }
 0x21d   : > { %v2898_v14 = vpack.c.b16 %v901_v52, %v900_v42 }
 0x21e   : > { %vm947_vm0 = vnez %v927_v9 }
 0x21f   : > { %v2821_v26 = vsel %vm947_vm0, 16843009, %v2493_v23 }
 0x220   : > { %v991_v47 = vunpack.c.1.s8 %v2821_v26 }
 0x221   : > { %705 = vadd.xlane.f32.xlu0 %v676_v10  ;;  %689 = vadd.xlane.f32.xlu2 %v668_v13  ;;  %v899_v10 = vunpack.c.1.s8 %v2791_v1  ;;  %v1962_v13 = vunpack.c.h.bf16 %v2762_v18  ;;  %v2818_v18 = vsel %vm2799_vm13, 16843009, %v2493_v23 }
 0x222   : > { %687 = vadd.xlane.f32.xlu1 %v667_v11  ;;  %v878_v11 = vunpack.c.3.s8 %v2776_v30  ;;  %v897_v30 = vunpack.c.0.s8 %v2791_v1  ;;  %v972_v37 = vunpack.c.0.s8 %v2818_v18  ;;  %v973_v40 = vunpack.c.1.s8 %v2818_v18 }
 0x223   : > { %v930_v21 = vpack.c.b16 %v899_v10, %v898_v5  ;;  %v2826_v31 = vmul.f32 %v2736_v46, %v1962_v13  ;;  %v990_v46 = vunpack.c.0.s8 %v2821_v26 }
 0x224   : > { %v910_v22 = vpack.c.b16 %v879_v12, %v878_v11  ;;  %v2847_v48 = vpack.c.b16 %v897_v30, %v896_v29 }
 0x225   : > { %v931_v27 = vpack.c.b8 %v930_v21, %v930_v21 }
 0x226   : > { %v911_v28 = vpack.c.b8 %v910_v22, %v910_v22  ;;  %v929_v13 = vpack.c.b8 %v2847_v48, %v2847_v48 }
 0x227   : > { %vm949_vm3 = vnez %v931_v27 }
 0x228   : > { %vm2839_vm4 = vnez %v911_v28  ;;  %v2852_v51 = vsel %vm949_vm3, 16843009, %v2493_v23  ;;  %vm2923_vm3 = vcmp.ne.s32.totalorder %v973_v40, 0 }
 0x229   : > { %707 = vadd.xlane.f32.xlu0 %v677_v16  ;;  %v989_v16 = vunpack.c.1.s8 %v962_v3  ;;  %v2871_v59 = vsel %vm2839_vm4, 16843009, %v2493_v23  ;;  %v994_v21 = vunpack.c.0.s8 %v2852_v51 }
 0x22a   : > { %709 = vadd.xlane.f32.xlu1 %v678_v17 }
 0x22b   : > { %vm2832_vm2 = vcmp.ne.s32.totalorder %v989_v16, 0 }
 0x232   : > { %691 = vadd.xlane.f32.xlu1 %v669_v20  ;;  %v952_v20 = vsel %vm936_vm12, 16843009, %v2493_v23 }
 0x233   : > { %v968_v33 = vunpack.c.0.s8 %v952_v20  ;;  %v969_v34 = vunpack.c.1.s8 %v952_v20 }
 0x235   : > { %vm2888_vm13 = vcmp.ne.s32.totalorder %v968_v33, 0  ;;  %vm2892_vm0 = vcmp.ne.s32.totalorder %v969_v34, 0 }
 0x27c   : > { %v696_v38 = vpop.xlane.xlu0 %695  ;;  %v700_v45 = vpop.xlane.xlu2 %699 }
 0x27d   : > { %v680_v39 = vpop.xlane.xlu1 %679  ;;  %v744_v43 = vadd.f32 %v2788_v62, %v696_v38  ;;  %v745_v44 = vadd.f32 %v2796_v6, %v696_v38  ;;  %v748_v49 = vadd.f32 %v2788_v62, %v700_v45  ;;  %v749_v50 = vadd.f32 %v2796_v6, %v700_v45 }
 0x27e   : > { %v728_v55 = vadd.f32 %v2788_v62, %v680_v39  ;;  %v729_v61 = vadd.f32 %v2796_v6, %v680_v39 }
 0x27f   : > { %v808_v53 = vmul.f32 0.2, %v744_v43  ;;  %v809_v54 = vmul.f32 0.2, %v745_v44  ;;  %vm776_vm8 = vcmp.gt.f32.partialorder %v744_v43, 0.0  ;;  %vm777_vm9 = vcmp.gt.f32.partialorder %v745_v44, 0.0 }
 0x280   : > { %v812_v63 = vmul.f32 0.2, %v748_v49  ;;  %v813_v4 = vmul.f32 0.2, %v749_v50  ;;  %vm780_vm11 = vcmp.gt.f32.partialorder %v748_v49, 0.0  ;;  %vm781_vm12 = vcmp.gt.f32.partialorder %v749_v50, 0.0 }
 0x281   : > { %v840_v2 = vsel %vm776_vm8, %v744_v43, %v808_v53  ;;  %v841_v3 = vsel %vm777_vm9, %v745_v44, %v809_v54  ;;  %v792_v15 = vmul.f32 0.2, %v728_v55  ;;  %v793_v16 = vmul.f32 0.2, %v729_v61 }
 0x282   : > { %v2880_v5 = vsel %vm2806_vm14, %v840_v2, -1e+30  ;;  %v2884_v7 = vsel %vm2810_vm15, %v841_v3, -1e+30  ;;  %v844_v8 = vsel %vm780_vm11, %v748_v49, %v812_v63  ;;  %v845_v10 = vsel %vm781_vm12, %v749_v50, %v813_v4 }
 0x283   : > { %v1088_v9 = vmax.f32 %v2880_v5, %v2884_v7  ;;  %v2902_v20 = vsel %vm2828_vm1, %v844_v8, -1e+30  ;;  %v2914_v30 = vsel %vm2832_vm2, %v845_v10, -1e+30  ;;  %vm760_vm14 = vcmp.gt.f32.partialorder %v728_v55, 0.0 }
 0x284   : > { %v698_v17 = vpop.xlane.xlu0 %697  ;;  %v702_v28 = vpop.xlane.xlu2 %701  ;;  %vm761_vm15 = vcmp.gt.f32.partialorder %v729_v61, 0.0  ;;  %vm2919_vm1 = vcmp.ne.s32.totalorder %v972_v37, 0  ;;  %v824_v50 = vsel %vm760_vm14, %v728_v55, %v792_v15  ;;  %v1094_v55 = vmax.f32 %v2902_v20, %v2914_v30 }
 0x285   : > { %v682_v19 = vpop.xlane.xlu1 %681  ;;  %v746_v22 = vadd.f32 %v2788_v62, %v698_v17  ;;  %v747_v24 = vadd.f32 %v2796_v6, %v698_v17  ;;  %1089 = vmax.xlane.f32.xlu2 %v1088_v9  ;;  %v2910_v29 = vadd.f32 %v2788_v62, %v702_v28  ;;  %v751_v35 = vadd.f32 %v2796_v6, %v702_v28 }
 0x286   : > { %v730_v25 = vadd.f32 %v2788_v62, %v682_v19  ;;  %v731_v27 = vadd.f32 %v2796_v6, %v682_v19  ;;  %v825_v52 = vsel %vm761_vm15, %v729_v61, %v793_v16  ;;  %v974_v61 = vunpack.c.0.s8 %v2871_v59 }
 0x287   : > { %v810_v32 = vmul.f32 0.2, %v746_v22  ;;  %v811_v33 = vmul.f32 0.2, %v747_v24  ;;  %vm778_vm2 = vcmp.gt.f32.partialorder %v746_v22, 0.0  ;;  %vm779_vm4 = vcmp.gt.f32.partialorder %v747_v24, 0.0 }
 0x288   : > { %v794_v34 = vmul.f32 0.2, %v730_v25  ;;  %v795_v36 = vmul.f32 0.2, %v731_v27  ;;  %vm762_vm8 = vcmp.gt.f32.partialorder %v730_v25, 0.0  ;;  %vm763_vm9 = vcmp.gt.f32.partialorder %v731_v27, 0.0 }
 0x289   : > { %v842_v41 = vsel %vm778_vm2, %v746_v22, %v810_v32  ;;  %v843_v42 = vsel %vm779_vm4, %v747_v24, %v811_v33  ;;  %v815_v3 = vmul.f32 0.2, %v751_v35  ;;  %v2973_v8 = vsel %vm2888_vm13, %v824_v50, -1e+30 }
 0x28a   : > { %v826_v43 = vsel %vm762_vm8, %v730_v25, %v794_v34  ;;  %v2929_v44 = vsel %vm2856_vm5, %v842_v41, -1e+30  ;;  %v2933_v18 = vsel %vm2860_vm6, %v843_v42, -1e+30  ;;  %v827_v37 = vsel %vm763_vm9, %v731_v27, %v795_v36 }
 0x28b   : > { %v2937_v40 = vsel %vm2864_vm7, %v826_v43, -1e+30  ;;  %v1091_v45 = vmax.f32 %v2929_v44, %v2933_v18  ;;  %v2943_v49 = vsel %vm2874_vm10, %v827_v37, -1e+30  ;;  %vm2949_vm5 = vcmp.ne.s32.totalorder %v990_v46, 0  ;;  %v3002_v43 = vld [vmem:[%s2767_s30 + $0x10] sm:$0xff] }
 0x28c   : > { %vm2955_vm6 = vcmp.ne.s32.totalorder %v991_v47, 0  ;;  %v684_v56 = vpop.xlane.xlu0 %683  ;;  %v1067_v57 = vmax.f32 %v2937_v40, %v2943_v49  ;;  %v975_v46 = vunpack.c.1.s8 %v2871_v59  ;;  %v814_v47 = vmul.f32 0.2, %v2910_v29  ;;  %v704_v2 = vpop.xlane.xlu2 %703 }
 0x28d   : > { %v686_v58 = vpop.xlane.xlu1 %685  ;;  %v732_v63 = vadd.f32 %v2788_v62, %v684_v56  ;;  %v733_v26 = vadd.f32 %v2796_v6, %v684_v56  ;;  %693 = vadd.xlane.f32.xlu2 %v2826_v31  ;;  %1092 = vmax.xlane.f32.xlu0 %v1091_v45  ;;  %v2977_v59 = vsel %vm2892_vm0, %v825_v52, -1e+30  ;;  %vm782_vm7 = vcmp.gt.f32.partialorder %v2910_v29, 0.0 }
 0x28e   : > { %v734_v0 = vadd.f32 %v2788_v62, %v686_v58  ;;  %1068 = vmax.xlane.f32.xlu1 %v1067_v57  ;;  %v735_v4 = vadd.f32 %v2796_v6, %v686_v58  ;;  %vm783_vm10 = vcmp.gt.f32.partialorder %v751_v35, 0.0  ;;  %v752_v15 = vadd.f32 %v2788_v62, %v704_v2 }
 0x28f   : > { %v796_v9 = vmul.f32 0.2, %v732_v63  ;;  %v797_v31 = vmul.f32 0.2, %v733_v26  ;;  %vm764_vm11 = vcmp.gt.f32.partialorder %v732_v63, 0.0  ;;  %vm765_vm12 = vcmp.gt.f32.partialorder %v733_v26, 0.0 }
 0x290   : > { %v798_v10 = vmul.f32 0.2, %v734_v0  ;;  %v1064_v16 = vmax.f32 %v2973_v8, %v2977_v59  ;;  %v2984_v19 = vadd.f32 %v2796_v6, %v704_v2  ;;  %v799_v12 = vmul.f32 0.2, %v735_v4 }
 0x291   : > { %v828_v11 = vsel %vm764_vm11, %v732_v63, %v796_v9  ;;  %v829_v17 = vsel %vm765_vm12, %v733_v26, %v797_v31  ;;  %v995_v25 = vunpack.c.1.s8 %v2852_v51  ;;  %v846_v28 = vsel %vm782_vm7, %v2910_v29, %v814_v47  ;;  %v3005_v29 = vld [vmem:[%s2767_s30 + $0x18] sm:$0xff] }
 0x292   : > { %v2988_v22 = vsel %vm2919_vm1, %v828_v11, -1e+30  ;;  %v2992_v24 = vsel %vm2923_vm3, %v829_v17, -1e+30  ;;  %v847_v32 = vsel %vm783_vm10, %v751_v35, %v815_v3  ;;  %vm766_vm13 = vcmp.gt.f32.partialorder %v734_v0, 0.0  ;;  %v1857_v11 = vld [vmem:[#allocation3 + $0x30] sm:$0xff] }
 0x293   : > { %v1070_v27 = vmax.f32 %v2988_v22, %v2992_v24  ;;  %v816_v34 = vmul.f32 0.2, %v752_v15  ;;  %vm767_vm0 = vcmp.gt.f32.partialorder %v735_v4, 0.0  ;;  %v830_v36 = vsel %vm766_vm13, %v734_v0, %v798_v10 }
 0x294   : > { %v706_v33 = vpop.xlane.xlu0 %705  ;;  %vm1006_vm14 = vcmp.ne.s32.totalorder %v974_v61, 0  ;;  %v817_v42 = vmul.f32 0.2, %v2984_v19  ;;  %vm1007_vm15 = vcmp.ne.s32.totalorder %v975_v46, 0  ;;  %v3009_v35 = vsel %vm2949_vm5, %v846_v28, -1e+30 }
 0x295   : > { %v688_v38 = vpop.xlane.xlu1 %687  ;;  %v754_v39 = vadd.f32 %v2788_v62, %v706_v33  ;;  %v755_v41 = vadd.f32 %v2796_v6, %v706_v33  ;;  %1095 = vmax.xlane.f32.xlu2 %v1094_v55  ;;  %1065 = vmax.xlane.f32.xlu0 %v1064_v16  ;;  %v3013_v37 = vsel %vm2955_vm6, %v847_v32, -1e+30  ;;  %v831_v45 = vsel %vm767_vm0, %v735_v4, %v799_v12  ;;  %v1866_v4 = vld [vmem:[#allocation3 + $0x78] sm:$0xff]  ;;  %v1865_v28 = vld [vmem:[#allocation3 + $0x70] sm:$0xff] }
 0x296   : > { %1071 = vmax.xlane.f32.xlu1 %v1070_v27  ;;  %v3015_v50 = vsel %vm1006_vm14, %v830_v36, -1e+30  ;;  %vm1026_vm1 = vcmp.ne.s32.totalorder %v994_v21, 0  ;;  %vm1027_vm3 = vcmp.ne.s32.totalorder %v995_v25, 0  ;;  %v3019_v57 = vsel %vm1007_vm15, %v831_v45, -1e+30  ;;  %2033 = vmatpush.bf16.msra.mxu3 %v1866_v4 }
 0x297   : > { %v818_v52 = vmul.f32 0.2, %v754_v39  ;;  %v819_v56 = vmul.f32 0.2, %v755_v41  ;;  %vm786_vm2 = vcmp.gt.f32.partialorder %v754_v39, 0.0  ;;  %vm787_vm4 = vcmp.gt.f32.partialorder %v755_v41, 0.0  ;;  %1465 = vmatpush.bf16.msra.mxu1 %v1866_v4 }
 0x298   : > { %vm948_vm8 = vnez %v929_v13  ;;  %v1097_v53 = vmax.f32 %v3009_v35, %v3013_v37  ;;  %v1073_v55 = vmax.f32 %v3015_v50, %v3019_v57  ;;  %vm858_vm9 = vnez %v3002_v43  ;;  %v690_v13 = vpop.xlane.xlu2 %689 }
 0x299   : > { %v850_v54 = vsel %vm786_vm2, %v754_v39, %v818_v52  ;;  %v851_v58 = vsel %vm787_vm4, %v755_v41, %v819_v56  ;;  %v933_v61 = vpack.c.b8 %v2898_v14, %v2898_v14  ;;  %vm859_vm5 = vnez %v3005_v29  ;;  %v1858_v14 = vld [vmem:[#allocation3 + $0x38] sm:$0xff] }
 0x29a   : > { %v3029_v51 = vsel %vm1026_vm1, %v850_v54, -1e+30  ;;  %v3031_v21 = vsel %vm1027_vm3, %v851_v58, -1e+30  ;;  %vm784_vm6 = vcmp.gt.f32.partialorder %v752_v15, 0.0  ;;  %vm785_vm7 = vcmp.gt.f32.partialorder %v2984_v19, 0.0  ;;  %2025 = vmatpush.bf16.msra.mxu2 %v1858_v14  ;;  %1416 = vmatpush.bf16.msra.mxu0 %v1858_v14 }
 0x29b   : > { %v1103_v48 = vmax.f32 %v3029_v51, %v3031_v21  ;;  %v964_v46 = vsel %vm948_vm8, 16843009, %v2493_v23  ;;  %v3041_v26 = vadd.f32 %v2788_v62, %v688_v38  ;;  %v848_v0 = vsel %vm784_vm6, %v752_v15, %v816_v34  ;;  %2034 = vmatpush.bf16.msra.mxu3 %v1865_v28  ;;  %v1864_v54 = vld [vmem:[#allocation3 + $0x68] sm:$0xff]  ;;  %1466 = vmatpush.bf16.msra.mxu1 %v1865_v28 }
 0x29c   : > { %v708_v63 = vpop.xlane.xlu0 %707  ;;  %v992_v2 = vunpack.c.0.s8 %v964_v46  ;;  %v993_v3 = vunpack.c.1.s8 %v964_v46  ;;  %v849_v10 = vsel %vm785_vm7, %v2984_v19, %v817_v42  ;;  %vm950_vm10 = vnez %v933_v61  ;;  %v1856_v42 = vld [vmem:[#allocation3 + $0x28] sm:$0xff] }
 0x29d   : > { %v710_v47 = vpop.xlane.xlu1 %709  ;;  %v756_v9 = vadd.f32 %v2788_v62, %v708_v63  ;;  %v757_v31 = vadd.f32 %v2796_v6, %v708_v63  ;;  %1098 = vmax.xlane.f32.xlu0 %v1097_v53  ;;  %1074 = vmax.xlane.f32.xlu2 %v1073_v55  ;;  %v3047_v16 = vadd.f32 %v2796_v6, %v688_v38  ;;  %v966_v15 = vsel %vm950_vm10, 16843009, %v2493_v23 }
 0x29e   : > { %1104 = vmax.xlane.f32.xlu1 %v1103_v48  ;;  %vm1024_vm11 = vcmp.ne.s32.totalorder %v992_v2, 0  ;;  %vm1025_vm12 = vcmp.ne.s32.totalorder %v993_v3, 0  ;;  %v3051_v25 = vadd.f32 %v2788_v62, %v690_v13  ;;  %v996_v27 = vunpack.c.0.s8 %v966_v15  ;;  %2026 = vmatpush.bf16.msra.mxu2 %v1857_v11 }
 0x29f   : > { %v820_v17 = vmul.f32 0.2, %v756_v9  ;;  %v821_v12 = vmul.f32 0.2, %v757_v31  ;;  %v800_v19 = vmul.f32 0.2, %v3041_v26  ;;  %v997_v34 = vunpack.c.1.s8 %v966_v15  ;;  %1417 = vmatpush.bf16.msra.mxu0 %v1857_v11  ;;  %2035 = vmatpush.bf16.msra.mxu3 %v1864_v54 }
 0x2a0   : > { %v3054_v32 = vsel %vm1024_vm11, %v848_v0, -1e+30  ;;  %v3056_v33 = vsel %vm1025_vm12, %v849_v10, -1e+30  ;;  %vm788_vm13 = vcmp.gt.f32.partialorder %v756_v9, 0.0  ;;  %vm789_vm0 = vcmp.gt.f32.partialorder %v757_v31, 0.0  ;;  %1467 = vmatpush.bf16.msra.mxu1 %v1864_v54 }
 0x2a1   : > { %v1100_v38 = vmax.f32 %v3054_v32, %v3056_v33  ;;  %vm1028_vm14 = vcmp.ne.s32.totalorder %v996_v27, 0  ;;  %v801_v36 = vmul.f32 0.2, %v3047_v16  ;;  %v852_v39 = vsel %vm788_vm13, %v756_v9, %v820_v17 }
 0x2a2   : > { %v853_v41 = vsel %vm789_vm0, %v757_v31, %v821_v12  ;;  %vm1029_vm15 = vcmp.ne.s32.totalorder %v997_v34, 0  ;;  %v739_v45 = vadd.f32 %v2796_v6, %v690_v13  ;;  %v3063_v52 = vadd.f32 %v2788_v62, %v710_v47  ;;  %2027 = vmatpush.bf16.msra.mxu2 %v1856_v42 }
 0x2a3   : > { %v3065_v56 = vsel %vm1028_vm14, %v852_v39, -1e+30  ;;  %v3067_v53 = vsel %vm1029_vm15, %v853_v41, -1e+30  ;;  %v3070_v58 = vadd.f32 %v2796_v6, %v710_v47  ;;  %v3077_v61 = vsel %vm858_vm9, 16843009, %v2493_v23  ;;  %1418 = vmatpush.bf16.msra.mxu0 %v1856_v42 }
 0x2a4   : > { %v1106_v55 = vmax.f32 %v3065_v56, %v3067_v53  ;;  %v3082_v48 = vsel %vm859_vm5, 16843009, %v2493_v23  ;;  %vm768_vm1 = vcmp.gt.f32.partialorder %v3041_v26, 0.0  ;;  %vm769_vm3 = vcmp.gt.f32.partialorder %v3047_v16, 0.0 }
 0x2a5   : > { %v692_v13 = vpop.xlane.xlu1 %691  ;;  %1101 = vmax.xlane.f32.xlu0 %v1100_v38  ;;  %v880_v46 = vunpack.c.0.s8 %v3077_v61  ;;  %v881_v63 = vunpack.c.0.s8 %v3082_v48  ;;  %v882_v29 = vunpack.c.1.s8 %v3077_v61  ;;  %v883_v0 = vunpack.c.1.s8 %v3082_v48 }
 0x2a6   : > { %1107 = vmax.xlane.f32.xlu1 %v1106_v55  ;;  %v3089_v43 = vadd.f32 %v2788_v62, %v692_v13  ;;  %v3092_v47 = vadd.f32 %v2796_v6, %v692_v13  ;;  %v802_v2 = vmul.f32 0.2, %v3051_v25  ;;  %v803_v3 = vmul.f32 0.2, %v739_v45 }
 0x2a7   : > { %v822_v14 = vmul.f32 0.2, %v3063_v52  ;;  %v912_v4 = vpack.c.b16 %v881_v63, %v880_v46  ;;  %v823_v9 = vmul.f32 0.2, %v3070_v58  ;;  %vm770_vm2 = vcmp.gt.f32.partialorder %v3051_v25, 0.0 }
 0x2a8   : > { %vm771_vm4 = vcmp.gt.f32.partialorder %v739_v45, 0.0  ;;  %v914_v31 = vpack.c.b16 %v883_v0, %v882_v29  ;;  %v832_v10 = vsel %vm768_vm1, %v3041_v26, %v800_v19  ;;  %v833_v15 = vsel %vm769_vm3, %v3047_v16, %v801_v36 }
 0x2a9   : > { %v913_v11 = vpack.c.b8 %v912_v4, %v912_v4  ;;  %v902_v17 = vunpack.c.3.s8 %v2786_v60  ;;  %v804_v12 = vmul.f32 0.2, %v3089_v43  ;;  %v805_v27 = vmul.f32 0.2, %v3092_v47 }
 0x2aa   : > { %v915_v28 = vpack.c.b8 %v914_v31, %v914_v31  ;;  %v903_v34 = vunpack.c.3.s8 %v2791_v1  ;;  %v834_v38 = vsel %vm770_vm2, %v3051_v25, %v802_v2  ;;  %v835_v39 = vsel %vm771_vm4, %v739_v45, %v803_v3 }
 0x2ab   : > { %vm940_vm8 = vnez %v913_v11  ;;  %v884_v26 = vunpack.c.2.s8 %v3077_v61  ;;  %v885_v36 = vunpack.c.2.s8 %v3082_v48  ;;  %vm790_vm5 = vcmp.gt.f32.partialorder %v3063_v52, 0.0 }
 0x2ac   : > { %v956_v19 = vsel %vm940_vm8, 16843009, %v2493_v23  ;;  %vm941_vm9 = vnez %v915_v28  ;;  %v934_v16 = vpack.c.b16 %v903_v34, %v902_v17  ;;  %vm791_vm10 = vcmp.gt.f32.partialorder %v3070_v58, 0.0 }
 0x2ad   : > { %v976_v60 = vunpack.c.0.s8 %v956_v19  ;;  %v977_v41 = vunpack.c.1.s8 %v956_v19  ;;  %v957_v42 = vsel %vm941_vm9, 16843009, %v2493_v23  ;;  %v916_v13 = vpack.c.b16 %v885_v36, %v884_v26  ;;  %v1862_v26 = vld [vmem:[#allocation3 + $0x58] sm:$0xff]  ;;  %v1853_v19 = vld [vmem:[#allocation3 + $0x10] sm:$0xff]  ;;  %v1852_v36 = vld [vmem:[#allocation3 + $0x8] sm:$0xff] }
 0x2ae   : > { %v978_v54 = vunpack.c.0.s8 %v957_v42  ;;  %v979_v1 = vunpack.c.1.s8 %v957_v42  ;;  %v935_v55 = vpack.c.b8 %v934_v16, %v934_v16  ;;  %vm772_vm11 = vcmp.gt.f32.partialorder %v3089_v43, 0.0  ;;  %v1861_v16 = vld [vmem:[#allocation3 + $0x50] sm:$0xff] }
 0x2af   : > { %vm1008_vm6 = vcmp.ne.s32.totalorder %v976_v60, 0  ;;  %vm1009_vm7 = vcmp.ne.s32.totalorder %v977_v41, 0  ;;  %vm773_vm14 = vcmp.gt.f32.partialorder %v3092_v47, 0.0  ;;  %v917_v3 = vpack.c.b8 %v916_v13, %v916_v13  ;;  %v1860_v60 = vld [vmem:[#allocation3 + $0x48] sm:$0xff] }
 0x2b0   : > { %v3118_v25 = vsel %vm1008_vm6, %v832_v10, -1e+30  ;;  %v3120_v45 = vsel %vm1009_vm7, %v833_v15, -1e+30  ;;  %vm1010_vm12 = vcmp.ne.s32.totalorder %v978_v54, 0  ;;  %vm1011_vm13 = vcmp.ne.s32.totalorder %v979_v1, 0 }
 0x2b1   : > { %v1076_v46 = vmax.f32 %v3118_v25, %v3120_v45  ;;  %v3124_v63 = vsel %vm1010_vm12, %v834_v38, -1e+30  ;;  %v3126_v29 = vsel %vm1011_vm13, %v835_v39, -1e+30  ;;  %vm951_vm0 = vnez %v935_v55  ;;  %v1854_v39 = vld [vmem:[#allocation3 + $0x18] sm:$0xff]  ;;  %v1851_v1 = vld [vmem:[#allocation3] sm:$0xff] }
 0x2b2   : > { %v1079_v0 = vmax.f32 %v3124_v63, %v3126_v29  ;;  %v967_v2 = vsel %vm951_vm0, 16843009, %v2493_v23  ;;  %v854_v4 = vsel %vm790_vm5, %v3063_v52, %v822_v14  ;;  %v855_v31 = vsel %vm791_vm10, %v3070_v58, %v823_v9  ;;  %v1859_v55 = vld [vmem:[#allocation3 + $0x40] sm:$0xff] }
 0x2b3   : > { %1077 = vmax.xlane.f32.xlu2 %v1076_v46  ;;  %v998_v10 = vunpack.c.0.s8 %v967_v2  ;;  %v999_v15 = vunpack.c.1.s8 %v967_v2  ;;  %v836_v11 = vsel %vm772_vm11, %v3089_v43, %v804_v12  ;;  %vm942_vm15 = vnez %v917_v3  ;;  %v1855_v12 = vld [vmem:[#allocation3 + $0x20] sm:$0xff] }
 0x2b4   : > { %1080 = vmax.xlane.f32.xlu0 %v1079_v0  ;;  %v837_v17 = vsel %vm773_vm14, %v3092_v47, %v805_v27  ;;  %v958_v28 = vsel %vm942_vm15, 16843009, %v2493_v23  ;;  %v1863_v27 = vld [vmem:[#allocation3 + $0x60] sm:$0xff]  ;;  %2028 = vmatpush.bf16.msra.mxu2 %v1855_v12  ;;  %v886_v41 = vunpack.c.3.s8 %v3077_v61  ;;  %v887_v42 = vunpack.c.3.s8 %v3082_v48 }
 0x2b5   : > { %vm1030_vm1 = vcmp.ne.s32.totalorder %v998_v10, 0  ;;  %vm1031_vm3 = vcmp.ne.s32.totalorder %v999_v15, 0  ;;  %v980_v14 = vunpack.c.0.s8 %v958_v28  ;;  %v981_v58 = vunpack.c.1.s8 %v958_v28  ;;  %2036 = vmatpush.bf16.msra.mxu3 %v1863_v27  ;;  %1419 = vmatpush.bf16.msra.mxu0 %v1855_v12 }
 0x2b6   : > { %v3143_v34 = vsel %vm1030_vm1, %v854_v4, -1e+30  ;;  %v3145_v52 = vsel %vm1031_vm3, %v855_v31, -1e+30  ;;  %1468 = vmatpush.bf16.msra.mxu1 %v1863_v27  ;;  %v918_v54 = vpack.c.b16 %v887_v42, %v886_v41 }
 0x2b7   : > { %v1109_v9 = vmax.f32 %v3143_v34, %v3145_v52  ;;  %vm1012_vm2 = vcmp.ne.s32.totalorder %v980_v14, 0  ;;  %vm1013_vm4 = vcmp.ne.s32.totalorder %v981_v58, 0 }
 0x2b8   : > { %v3149_v38 = vsel %vm1012_vm2, %v836_v11, -1e+30  ;;  %v3151_v43 = vsel %vm1013_vm4, %v837_v17, -1e+30  ;;  %2029 = vmatpush.bf16.msra.mxu2 %v1854_v39  ;;  %v919_v13 = vpack.c.b8 %v918_v54, %v918_v54 }
 0x2b9   : > { %v1082_v47 = vmax.f32 %v3149_v38, %v3151_v43  ;;  %2037 = vmatpush.bf16.msra.mxu3 %v1862_v26  ;;  %1420 = vmatpush.bf16.msra.mxu0 %v1854_v39 }
 0x2ba   : > { %1469 = vmatpush.bf16.msra.mxu1 %v1862_v26  ;;  %vm943_vm8 = vnez %v919_v13 }
 0x2bb   : > { %1110 = vmax.xlane.f32.xlu2 %v1109_v9  ;;  %v959_v61 = vsel %vm943_vm8, 16843009, %v2493_v23 }
 0x2bc   : > { %1083 = vmax.xlane.f32.xlu0 %v1082_v47  ;;  %2030 = vmatpush.bf16.msra.mxu2 %v1853_v19  ;;  %v982_v2 = vunpack.c.0.s8 %v959_v61  ;;  %v983_v3 = vunpack.c.1.s8 %v959_v61 }
 0x2bd   : > { %2038 = vmatpush.bf16.msra.mxu3 %v1861_v16  ;;  %1421 = vmatpush.bf16.msra.mxu0 %v1853_v19 }
 0x2be   : > { %1470 = vmatpush.bf16.msra.mxu1 %v1861_v16  ;;  %vm3166_vm9 = vcmp.ne.s32.totalorder %v982_v2, 0  ;;  %vm3170_vm5 = vcmp.ne.s32.totalorder %v983_v3, 0 }
 0x2c0   : > { %2031 = vmatpush.bf16.msra.mxu2 %v1852_v36 }
 0x2c1   : > { %2039 = vmatpush.bf16.msra.mxu3 %v1860_v60  ;;  %1422 = vmatpush.bf16.msra.mxu0 %v1852_v36 }
 0x2c2   : > { %1471 = vmatpush.bf16.msra.mxu1 %v1860_v60 }
 0x2c4   : > { %2032 = vmatpush.bf16.msra.mxu2 %v1851_v1 }
 0x2c5   : > { %2040 = vmatpush.bf16.msra.mxu3 %v1859_v55  ;;  %1423 = vmatpush.bf16.msra.mxu0 %v1851_v1 }
 0x2c6   : > { %1472 = vmatpush.bf16.msra.mxu1 %v1859_v55 }
 0x2f8   : > { %v1090_v46 = vpop.xlane.xlu2 %1089 }
 0x2f9   : > { %v1128_v0 = vsub.f32 %v2880_v5, %v1090_v46  ;;  %v1129_v48 = vsub.f32 %v2884_v7, %v1090_v46 }
 0x2fb   : > { %v1176_v4 = vmul.f32 1.442695, %v1128_v0  ;;  %v1178_v31 = vmul.f32 1.442695, %v1129_v48 }
 0x2fd   : > { %2143 = vpow2.f32 %v1176_v4 }
 0x2fe   : > { %2145 = vpow2.f32 %v1178_v31 }
 0x300   : > { %v694_v10 = vpop.xlane.xlu2 %693  ;;  %v1093_v15 = vpop.xlane.xlu0 %1092 }
 0x301   : > { %v742_v11 = vadd.f32 %v2788_v62, %v694_v10  ;;  %v743_v17 = vadd.f32 %v2796_v6, %v694_v10  ;;  %v1130_v28 = vsub.f32 %v2929_v44, %v1093_v15  ;;  %v1131_v14 = vsub.f32 %v2933_v18, %v1093_v15  ;;  %v1069_v58 = vpop.xlane.xlu1 %1068 }
 0x302   : > { %v1114_v5 = vsub.f32 %v2937_v40, %v1069_v58  ;;  %v1115_v23 = vsub.f32 %v2943_v49, %v1069_v58 }
 0x303   : > { %v806_v62 = vmul.f32 0.2, %v742_v11  ;;  %v807_v6 = vmul.f32 0.2, %v743_v17  ;;  %v1180_v47 = vmul.f32 1.442695, %v1130_v28  ;;  %v3184_v36 = vpop.eup %2143 }
 0x304   : > { %v1182_v44 = vmul.f32 1.442695, %v1131_v14  ;;  %v1148_v18 = vmul.f32 1.442695, %v1114_v5  ;;  %v1150_v12 = vmul.f32 1.442695, %v1115_v23  ;;  %v3190_v55 = vpop.eup %2145 }
 0x305   : > { %2147 = vpow2.f32 %v1180_v47  ;;  %vm774_vm6 = vcmp.gt.f32.partialorder %v742_v11, 0.0  ;;  %vm775_vm7 = vcmp.gt.f32.partialorder %v743_v17, 0.0 }
 0x306   : > { %2149 = vpow2.f32 %v1182_v44  ;;  %v838_v40 = vsel %vm774_vm6, %v742_v11, %v806_v62  ;;  %v839_v49 = vsel %vm775_vm7, %v743_v17, %v807_v6 }
 0x307   : > { %2151 = vpow2.f32 %v1148_v18  ;;  %v3176_v27 = vsel %vm3166_vm9, %v838_v40, -1e+30  ;;  %v3180_v39 = vsel %vm3170_vm5, %v839_v49, -1e+30 }
 0x308   : > { %2153 = vpow2.f32 %v1150_v12  ;;  %v1096_v26 = vpop.xlane.xlu2 %1095  ;;  %v1066_v19 = vpop.xlane.xlu0 %1065  ;;  %v1085_v16 = vmax.f32 %v3176_v27, %v3180_v39 }
 0x309   : > { %v1132_v60 = vsub.f32 %v2902_v20, %v1096_v26  ;;  %v1133_v41 = vsub.f32 %v2914_v30, %v1096_v26  ;;  %v1112_v42 = vsub.f32 %v2973_v8, %v1066_v19  ;;  %v1113_v54 = vsub.f32 %v2977_v59, %v1066_v19  ;;  %v1072_v1 = vpop.xlane.xlu1 %1071 }
 0x30a   : > { %v1116_v13 = vsub.f32 %v2988_v22, %v1072_v1  ;;  %v1117_v46 = vsub.f32 %v2992_v24, %v1072_v1  ;;  %1086 = vmax.xlane.f32.xlu1 %v1085_v16 }
 0x30b   : > { %v3194_v0 = vpop.eup %2147  ;;  %v1184_v61 = vmul.f32 1.442695, %v1132_v60  ;;  %v1186_v48 = vmul.f32 1.442695, %v1133_v41  ;;  %v1144_v2 = vmul.f32 1.442695, %v1112_v42 }
 0x30c   : > { %v3196_v20 = vpop.eup %2149  ;;  %v1146_v30 = vmul.f32 1.442695, %v1113_v54  ;;  %v1264_v8 = vpack.c.bf16 %v3194_v0, %v3184_v36  ;;  %v1152_v3 = vmul.f32 1.442695, %v1116_v13  ;;  %v1154_v24 = vmul.f32 1.442695, %v1117_v46 }
 0x30d   : > { %v2152_v59 = vpop.eup %2151  ;;  %2155 = vpow2.f32 %v1184_v61  ;;  %v1265_v22 = vpack.c.bf16 %v3196_v20, %v3190_v55 }
 0x30e   : > { %v2154_v4 = vpop.eup %2153  ;;  %2157 = vpow2.f32 %v1186_v48  ;;  %1444 = vmatmul.bf16.vlgmr.msra.gmra.mxu2 %v1264_v8 }
 0x30f   : > { %2159 = vpow2.f32 %v1144_v2  ;;  %1493 = vmatmul.bf16.vlgmr.msra.gmra.mxu3 %v1265_v22  ;;  %v1211_v31 = vadd.f32 %v2154_v4, %v2152_v59 }
 0x310   : > { %2161 = vpow2.f32 %v1146_v30  ;;  %v1099_v10 = vpop.xlane.xlu0 %1098  ;;  %v1075_v15 = vpop.xlane.xlu2 %1074 }
 0x311   : > { %2163 = vpow2.f32 %v1152_v3  ;;  %1212 = vadd.xlane.f32.xlu0 %v1211_v31  ;;  %v1134_v11 = vsub.f32 %v3009_v35, %v1099_v10  ;;  %v1135_v17 = vsub.f32 %v3013_v37, %v1099_v10  ;;  %v1118_v28 = vsub.f32 %v3015_v50, %v1075_v15  ;;  %v1105_v14 = vpop.xlane.xlu1 %1104 }
 0x312   : > { %2165 = vpow2.f32 %v1154_v24  ;;  %v1119_v58 = vsub.f32 %v3019_v57, %v1075_v15  ;;  %v1138_v5 = vsub.f32 %v3029_v51, %v1105_v14  ;;  %v1139_v23 = vsub.f32 %v3031_v21, %v1105_v14 }
 0x313   : > { %v2156_v7 = vpop.eup %2155  ;;  %v1188_v9 = vmul.f32 1.442695, %v1134_v11  ;;  %v1190_v62 = vmul.f32 1.442695, %v1135_v17  ;;  %v1156_v6 = vmul.f32 1.442695, %v1118_v28 }
 0x314   : > { %v2158_v47 = vpop.eup %2157  ;;  %v1158_v44 = vmul.f32 1.442695, %v1119_v58  ;;  %v1196_v35 = vmul.f32 1.442695, %v1138_v5  ;;  %v1198_v12 = vmul.f32 1.442695, %v1139_v23 }
 0x315   : > { %v2160_v18 = vpop.eup %2159  ;;  %2167 = vpow2.f32 %v1188_v9  ;;  %v3208_v37 = vadd.f32 %v2158_v47, %v2156_v7 }
 0x316   : > { %v2162_v50 = vpop.eup %2161  ;;  %2169 = vpow2.f32 %v1190_v62  ;;  %v1256_v40 = vpack.c.bf16 %v2152_v59, %v2160_v18 }
 0x317   : > { %v2164_v57 = vpop.eup %2163  ;;  %2171 = vpow2.f32 %v1156_v6  ;;  %v1208_v51 = vadd.f32 %v2162_v50, %v2160_v18  ;;  %v1257_v49 = vpack.c.bf16 %v2154_v4, %v2162_v50 }
 0x318   : > { %v2166_v21 = vpop.eup %2165  ;;  %2173 = vpow2.f32 %v1158_v44  ;;  %1424 = vmatmul.bf16.vlgmr.msra.gmra.mxu0 %v1256_v40  ;;  %v1102_v26 = vpop.xlane.xlu0 %1101 }
 0x319   : > { %2175 = vpow2.f32 %v1196_v35  ;;  %1209 = vadd.xlane.f32.xlu2 %v1208_v51  ;;  %1473 = vmatmul.bf16.vlgmr.msra.gmra.mxu1 %v1257_v49  ;;  %v1214_v19 = vadd.f32 %v2166_v21, %v2164_v57  ;;  %v1136_v60 = vsub.f32 %v3054_v32, %v1102_v26  ;;  %v1137_v42 = vsub.f32 %v3056_v33, %v1102_v26  ;;  %v1108_v4 = vpop.xlane.xlu1 %1107 }
 0x31a   : > { %2177 = vpow2.f32 %v1198_v12  ;;  %v1140_v58 = vsub.f32 %v3065_v56, %v1108_v4 }
 0x31b   : > { %v3210_v16 = vpop.eup %2167  ;;  %1215 = vadd.xlane.f32.xlu1 %v1214_v19  ;;  %v1192_v48 = vmul.f32 1.442695, %v1136_v60  ;;  %v1194_v8 = vmul.f32 1.442695, %v1137_v42 }
 0x31c   : > { %v3213_v41 = vpop.eup %2169  ;;  %v1266_v54 = vpack.c.bf16 %v3210_v16, %v2156_v7  ;;  %v1141_v7 = vsub.f32 %v3067_v53, %v1108_v4 }
 0x31d   : > { %v2172_v1 = vpop.eup %2171  ;;  %v1267_v13 = vpack.c.bf16 %v3213_v41, %v2158_v47  ;;  %2179 = vpow2.f32 %v1192_v48  ;;  %v1241_v48 = vadd.f32 %v3213_v41, %v3210_v16 }
 0x31e   : > { %v2174_v46 = vpop.eup %2173  ;;  %1449 = vmatmul.bf16.gmra.mxu2 %v1266_v54  ;;  %2181 = vpow2.f32 %v1194_v8  ;;  %v1258_v33 = vpack.c.bf16 %v2172_v1, %v2164_v57  ;;  %v1202_v51 = vmul.f32 1.442695, %v1141_v7 }
 0x31f   : > { %v2176_v61 = vpop.eup %2175  ;;  %1498 = vmatmul.bf16.gmra.mxu3 %v1267_v13  ;;  %v1217_v2 = vadd.f32 %v2174_v46, %v2172_v1  ;;  %v1259_v31 = vpack.c.bf16 %v2174_v46, %v2166_v21  ;;  %v1232_v13 = vadd.f32 %v3190_v55, %v3184_v36 }
 0x320   : > { %v2178_v30 = vpop.eup %2177 }
 0x321   : > { %1218 = vadd.xlane.f32.xlu2 %v1217_v2  ;;  %v3218_v59 = vadd.f32 %v2178_v30, %v2176_v61 }
 0x323   : > { %v3224_v11 = vpop.eup %2179 }
 0x324   : > { %v2182_v14 = vpop.eup %2181 }
 0x325   : > { %v1269_v23 = vpack.c.bf16 %v2178_v30, %v2182_v14  ;;  %v1244_v2 = vadd.f32 %v2182_v14, %v3224_v11 }
 0x326   : > { %v1078_v32 = vpop.xlane.xlu2 %1077 }
 0x327   : > { %v1120_v3 = vsub.f32 %v3118_v25, %v1078_v32  ;;  %v1121_v22 = vsub.f32 %v3120_v45, %v1078_v32  ;;  %v1081_v24 = vpop.xlane.xlu0 %1080  ;;  %v1268_v45 = vpack.c.bf16 %v2176_v61, %v3224_v11  ;;  %v1235_v61 = vadd.f32 %v3196_v20, %v3194_v0  ;;  %v3245_v11 = vld [vmem:[%s238_s12] ss:$0 sm:$0xff] }
 0x328   : > { %v1122_v10 = vsub.f32 %v3124_v63, %v1081_v24  ;;  %v1123_v15 = vsub.f32 %v3126_v29, %v1081_v24  ;;  %1429 = vmatmul.bf16.gmra.mxu0 %v1258_v33  ;;  %v1200_v63 = vmul.f32 1.442695, %v1140_v58 }
 0x329   : > { %v1160_v17 = vmul.f32 1.442695, %v1120_v3  ;;  %v1162_v28 = vmul.f32 1.442695, %v1121_v22  ;;  %1478 = vmatmul.bf16.gmra.mxu1 %v1259_v31 }
 0x32a   : > { %v1164_v5 = vmul.f32 1.442695, %v1122_v10  ;;  %v1166_v25 = vmul.f32 1.442695, %v1123_v15 }
 0x32b   : > { %2183 = vpow2.f32 %v1160_v17 }
 0x32c   : > { %2185 = vpow2.f32 %v1162_v28 }
 0x32d   : > { %2187 = vpow2.f32 %v1164_v5 }
 0x32e   : > { %2189 = vpow2.f32 %v1166_v25  ;;  %v1111_v29 = vpop.xlane.xlu2 %1110  ;;  %1454 = vmatmul.bf16.gmra.mxu2 %v1268_v45 }
 0x32f   : > { %v1142_v9 = vsub.f32 %v3143_v34, %v1111_v29  ;;  %v1143_v62 = vsub.f32 %v3145_v52, %v1111_v29  ;;  %v1084_v6 = vpop.xlane.xlu0 %1083  ;;  %1503 = vmatmul.bf16.gmra.mxu3 %v1269_v23  ;;  %2191 = vpow2.f32 %v1200_v63 }
 0x330   : > { %v1124_v56 = vsub.f32 %v3149_v38, %v1084_v6  ;;  %v1125_v47 = vsub.f32 %v3151_v43, %v1084_v6 }
 0x331   : > { %v2184_v44 = vpop.eup %2183  ;;  %v1204_v18 = vmul.f32 1.442695, %v1142_v9  ;;  %v1206_v35 = vmul.f32 1.442695, %v1143_v62 }
 0x332   : > { %v2186_v50 = vpop.eup %2185  ;;  %v1168_v12 = vmul.f32 1.442695, %v1124_v56  ;;  %v1170_v40 = vmul.f32 1.442695, %v1125_v47 }
 0x333   : > { %v2188_v57 = vpop.eup %2187  ;;  %2193 = vpow2.f32 %v1204_v18  ;;  %v1220_v53 = vadd.f32 %v2186_v50, %v2184_v44 }
 0x334   : > { %v2190_v34 = vpop.eup %2189  ;;  %2195 = vpow2.f32 %v1206_v35  ;;  %v1260_v38 = vpack.c.bf16 %v2188_v57, %v2184_v44 }
 0x335   : > { %1221 = vadd.xlane.f32.xlu0 %v1220_v53  ;;  %2197 = vpow2.f32 %v1168_v12  ;;  %v1223_v52 = vadd.f32 %v2190_v34, %v2188_v57  ;;  %v1261_v43 = vpack.c.bf16 %v2190_v34, %v2186_v50  ;;  %v2192_v49 = vpop.eup %2191 }
 0x336   : > { %2199 = vpow2.f32 %v1170_v40 }
 0x337   : > { %2201 = vpow2.f32 %v1202_v51  ;;  %1224 = vadd.xlane.f32.xlu1 %v1223_v52 }
 0x338   : > { %1434 = vmatmul.bf16.gmra.mxu0 %v1260_v38 }
 0x339   : > { %v2194_v21 = vpop.eup %2193  ;;  %1483 = vmatmul.bf16.gmra.mxu1 %v1261_v43 }
 0x33a   : > { %v2196_v26 = vpop.eup %2195  ;;  %v1270_v42 = vpack.c.bf16 %v2194_v21, %v2192_v49 }
 0x33b   : > { %v2198_v19 = vpop.eup %2197  ;;  %v1253_v8 = vadd.f32 %v2196_v26, %v2194_v21 }
 0x33c   : > { %v2200_v60 = vpop.eup %2199 }
 0x33d   : > { %v2202_v54 = vpop.eup %2201  ;;  %v1226_v1 = vadd.f32 %v2200_v60, %v2198_v19 }
 0x33e   : > { %1459 = vmatmul.bf16.gmra.mxu2 %v1270_v42  ;;  %v1271_v46 = vpack.c.bf16 %v2196_v26, %v2202_v54  ;;  %v1250_v30 = vadd.f32 %v2202_v54, %v2192_v49 }
 0x33f   : > { %1227 = vadd.xlane.f32.xlu2 %v1226_v1  ;;  %1233 = vadd.xlane.f32.xlu1 %v1232_v13 }
 0x340   : > { %1508 = vmatmul.bf16.gmra.mxu3 %v1271_v46 }
 0x347   : > { %1236 = vadd.xlane.f32.xlu2 %v1235_v61  ;;  %1242 = vadd.xlane.f32.xlu1 %v1241_v48 }
 0x34f   : > { %1245 = vadd.xlane.f32.xlu2 %v1244_v2  ;;  %1251 = vadd.xlane.f32.xlu1 %v1250_v30 }
 0x357   : > { %1254 = vadd.xlane.f32.xlu2 %v1253_v8 }
 0x37d   : > { %v1087_v36 = vpop.xlane.xlu1 %1086 }
 0x37e   : > { %v1126_v55 = vsub.f32 %v3176_v27, %v1087_v36  ;;  %v1127_v32 = vsub.f32 %v3180_v39, %v1087_v36 }
 0x380   : > { %v1172_v33 = vmul.f32 1.442695, %v1126_v55  ;;  %v1174_v3 = vmul.f32 1.442695, %v1127_v32 }
 0x382   : > { %2203 = vpow2.f32 %v1172_v33 }
 0x383   : > { %2205 = vpow2.f32 %v1174_v3 }
 0x384   : > { %v1213_v10 = vpop.xlane.xlu0 %1212 }
 0x388   : > { %v2204_v0 = vpop.eup %2203 }
 0x389   : > { %v2206_v20 = vpop.eup %2205  ;;  %v1262_v16 = vpack.c.bf16 %v2204_v0, %v2198_v19 }
 0x38a   : > { %v1263_v41 = vpack.c.bf16 %v2206_v20, %v2200_v60  ;;  %v1229_v22 = vadd.f32 %v2206_v20, %v2204_v0 }
 0x38b   : > { %1439 = vmatmul.bf16.gmra.mxu0 %v1262_v16 }
 0x38c   : > { %1488 = vmatmul.bf16.gmra.mxu1 %v1263_v41  ;;  %1230 = vadd.xlane.f32.xlu0 %v1229_v22  ;;  %v1210_v4 = vpop.xlane.xlu2 %1209 }
 0x38d   : > { %2207 = vrcp.f32 %v1210_v4 }
 0x38e   : > { %2209 = vrcp.f32 %v1213_v10 }
 0x391   : > { %v1445_v24 = vpop.f32.mrf.mxu2 }
 0x392   : > { %v1494_v31 = vpop.f32.mrf.mxu3 }
 0x393   : > { %v2208_v17 = vpop.eup %2207  ;;  %v1495_v13 = vadd.f32 %v1494_v31, %v1445_v24 }
 0x394   : > { %1239 = vadd.xlane.f32.xlu0 %v3208_v37  ;;  %v1216_v37 = vpop.xlane.xlu1 %1215  ;;  %v2210_v63 = vpop.eup %2209 }
 0x395   : > { %v1425_v27 = vpop.f32.mrf.mxu0  ;;  %2211 = vrcp.f32 %v1216_v37  ;;  %v1219_v47 = vpop.xlane.xlu2 %1218 }
 0x396   : > { %v1474_v39 = vpop.f32.mrf.mxu1  ;;  %2213 = vrcp.f32 %v1219_v47 }
 0x397   : > { %v1475_v15 = vadd.f32 %v1474_v39, %v1425_v27 }
 0x399   : > { %v1514_v28 = vmul.f32 %v2208_v17, %v1475_v15  ;;  %v1447_v14 = vpop.f32.mrf.mxu2 }
 0x39a   : > { %v1496_v58 = vpop.f32.mrf.mxu3 }
 0x39b   : > { %v3248_v5 = vadd.f32 %v3245_v11, %v1514_v28  ;;  %v2212_v18 = vpop.eup %2211  ;;  %v1497_v16 = vadd.f32 %v1496_v58, %v1447_v14 }
 0x39c   : > { %1248 = vadd.xlane.f32.xlu0 %v3218_v59  ;;  %v2214_v52 = vpop.eup %2213 }
 0x39d   : > { %v1427_v25 = vpop.f32.mrf.mxu0 }
 0x39e   : > { %v1476_v45 = vpop.f32.mrf.mxu1 }
 0x39f   : > { %v1477_v23 = vadd.f32 %v1476_v45, %v1427_v25 }
 0x3a1   : > { %v1515_v29 = vmul.f32 %v2210_v63, %v1477_v23  ;;  %v3251_v7 = vpop.f32.mrf.mxu2 }
 0x3a2   : > { %v3253_v9 = vpop.f32.mrf.mxu3 }
 0x3a3   : > { %v3256_v62 = vadd.f32 %v3245_v11, %v1515_v29 }
 0x3a5   : > { %v1430_v6 = vpop.f32.mrf.mxu0 }
 0x3a6   : > { %v1479_v56 = vpop.f32.mrf.mxu1 }
 0x3a7   : > { %v1480_v44 = vadd.f32 %v1479_v56, %v1430_v6 }
 0x3a8   : > { %v1222_v53 = vpop.xlane.xlu0 %1221 }
 0x3a9   : > { %v1516_v59 = vmul.f32 %v2212_v18, %v1480_v44  ;;  %v1452_v35 = vpop.f32.mrf.mxu2  ;;  %2215 = vrcp.f32 %v1222_v53 }
 0x3aa   : > { %v1225_v50 = vpop.xlane.xlu1 %1224  ;;  %v1501_v12 = vpop.f32.mrf.mxu3 }
 0x3ab   : > { %v3259_v40 = vadd.f32 %v3245_v11, %v1516_v59  ;;  %v1502_v22 = vadd.f32 %v1501_v12, %v1452_v35 }
 0x3ad   : > { %v1432_v57 = vpop.f32.mrf.mxu0 }
 0x3ae   : > { %v1481_v51 = vpop.f32.mrf.mxu1 }
 0x3af   : > { %v1482_v34 = vadd.f32 %v1481_v51, %v1432_v57  ;;  %v2216_v1 = vpop.eup %2215 }
 0x3b1   : > { %v1517_v38 = vmul.f32 %v2214_v52, %v1482_v34  ;;  %v1455_v43 = vpop.f32.mrf.mxu2 }
 0x3b2   : > { %v1228_v49 = vpop.xlane.xlu2 %1227  ;;  %v1234_v21 = vpop.xlane.xlu1 %1233 }
 0x3b3   : > { %v3262_v26 = vadd.f32 %v3245_v11, %v1517_v38  ;;  %v1504_v19 = vpop.f32.mrf.mxu3  ;;  %2217 = vrcp.f32 %v1234_v21  ;;  %v1500_v21 = vadd.f32 %v3253_v9, %v3251_v7 }
 0x3b4   : > { %2219 = vrcp.f32 %v1225_v50  ;;  %v1505_v45 = vadd.f32 %v1504_v19, %v1455_v43 }
 0x3b5   : > { %v1435_v60 = vpop.f32.mrf.mxu0 }
 0x3b6   : > { %v1484_v42 = vpop.f32.mrf.mxu1 }
 0x3b7   : > { %v1485_v54 = vadd.f32 %v1484_v42, %v1435_v60 }
 0x3b9   : > { %v1518_v46 = vmul.f32 %v2216_v1, %v1485_v54  ;;  %v3264_v61 = vpop.f32.mrf.mxu2  ;;  %v2218_v48 = vpop.eup %2217 }
 0x3ba   : > { %v1237_v2 = vpop.xlane.xlu2 %1236  ;;  %v1243_v30 = vpop.xlane.xlu1 %1242  ;;  %v1522_v8 = vmul.f32 %v2218_v48, %v1495_v13 }
 0x3bb   : > { %2221 = vrcp.f32 %v1237_v2  ;;  %v3267_v36 = vadd.f32 %v3245_v11, %v1518_v46  ;;  %v1506_v55 = vpop.f32.mrf.mxu3  ;;  %v2220_v20 = vpop.eup %2219 }
 0x3bc   : > { %2223 = vrcp.f32 %v1243_v30  ;;  %v3270_v32 = vadd.f32 %v3245_v11, %v1522_v8  ;;  %v1507_v30 = vadd.f32 %v1506_v55, %v3264_v61 }
 0x3bd   : > { %v1437_v33 = vpop.f32.mrf.mxu0 }
 0x3be   : > { %v1486_v3 = vpop.f32.mrf.mxu1 }
 0x3bf   : > { %v1487_v0 = vadd.f32 %v1486_v3, %v1437_v33 }
 0x3c1   : > { %v2222_v41 = vpop.eup %2221  ;;  %v1519_v4 = vmul.f32 %v2220_v20, %v1487_v0  ;;  %v1460_v24 = vpop.f32.mrf.mxu2 }
 0x3c2   : > { %v2224_v31 = vpop.eup %2223  ;;  %v1523_v27 = vmul.f32 %v2222_v41, %v1497_v16  ;;  %v1246_v39 = vpop.xlane.xlu2 %1245 }
 0x3c3   : > { %v1252_v10 = vpop.xlane.xlu1 %1251  ;;  %v1525_v15 = vmul.f32 %v2224_v31, %v1502_v22  ;;  %2225 = vrcp.f32 %v1246_v39  ;;  %v3273_v17 = vadd.f32 %v3245_v11, %v1519_v4  ;;  %v1509_v28 = vpop.f32.mrf.mxu3 }
 0x3c4   : > { %v3276_v25 = vadd.f32 %v3245_v11, %v1523_v27  ;;  %2227 = vrcp.f32 %v1252_v10  ;;  %v1510_v58 = vadd.f32 %v1509_v28, %v1460_v24 }
 0x3c5   : > { %v3279_v14 = vadd.f32 %v3245_v11, %v1525_v15 }
 0x3c9   : > { %v2226_v37 = vpop.eup %2225  ;;  %v1462_v56 = vpop.f32.mrf.mxu2 }
 0x3ca   : > { %v2228_v23 = vpop.eup %2227  ;;  %v1526_v63 = vmul.f32 %v2226_v37, %v1505_v45  ;;  %v1255_v29 = vpop.xlane.xlu2 %1254 }
 0x3cb   : > { %2229 = vrcp.f32 %v1255_v29  ;;  %v1528_v6 = vmul.f32 %v2228_v23, %v1510_v58  ;;  %v1511_v47 = vpop.f32.mrf.mxu3 }
 0x3cc   : > { %v3282_v44 = vadd.f32 %v3245_v11, %v1526_v63  ;;  %v1512_v59 = vadd.f32 %v1511_v47, %v1462_v56  ;;  %2231 = vrcp.f32 %v1228_v49 }
 0x3cd   : > { %v3285_v18 = vadd.f32 %v3245_v11, %v1528_v6 }
 0x3d1   : > { %v2230_v35 = vpop.eup %2229 }
 0x3d2   : > { %v1529_v50 = vmul.f32 %v2230_v35, %v1512_v59  ;;  %v2232_v38 = vpop.eup %2231 }
 0x3d4   : > { %v3288_v12 = vadd.f32 %v3245_v11, %v1529_v50 }
 0x3ff   : > { %v1231_v57 = vpop.xlane.xlu0 %1230 }
 0x407   : > { %v1240_v51 = vpop.xlane.xlu0 %1239 }
 0x408   : > { %2233 = vrcp.f32 %v1240_v51  ;;  %v1440_v53 = vpop.f32.mrf.mxu0 }
 0x409   : > { %v1489_v34 = vpop.f32.mrf.mxu1  ;;  %2235 = vrcp.f32 %v1231_v57 }
 0x40a   : > { %v1490_v52 = vadd.f32 %v1489_v34, %v1440_v53 }
 0x40c   : > { %v1520_v43 = vmul.f32 %v2232_v38, %v1490_v52 }
 0x40e   : > { %v2234_v19 = vpop.eup %2233  ;;  %v1540_v60 = vadd.f32 %v3245_v11, %v1520_v43 }
 0x40f   : > { %v1524_v42 = vmul.f32 %v2234_v19, %v1500_v21  ;;  %v1249_v54 = vpop.xlane.xlu0 %1248  ;;  %v2236_v48 = vpop.eup %2235 }
 0x410   : > { %2237 = vrcp.f32 %v1249_v54  ;;  %v1442_v1 = vpop.f32.mrf.mxu0 }
 0x411   : > { %v1544_v49 = vadd.f32 %v3245_v11, %v1524_v42  ;;  %v1491_v13 = vpop.f32.mrf.mxu1 }
 0x412   : > { %v1492_v46 = vadd.f32 %v1491_v13, %v1442_v1 }
 0x414   : > { %v1521_v2 = vmul.f32 %v2236_v48, %v1492_v46 }
 0x415   : > { %1553 = sbr.rel (%p1839_p5) target bundleno = 1068 (0x42c), region = 73 }
 0x416   : > { %v2238_v8 = vpop.eup %2237  ;;  %v1541_v33 = vadd.f32 %v3245_v11, %v1521_v2 }
 0x417   : > { %v1527_v7 = vmul.f32 %v2238_v8, %v1507_v30 }
 0x419   : > { %v1547_v9 = vadd.f32 %v3245_v11, %v1527_v7 }
 0x41a   : > { %v1554_v3 = vmax.f32 %v3248_v5, 0.0  ;;  %v1555_v0 = vmax.f32 %v3256_v62, 0.0  ;;  %v1556_v20 = vmax.f32 %v3259_v40, 0.0  ;;  %v1557_v16 = vmax.f32 %v3262_v26, 0.0 }
 0x41b   : > { %v1558_v61 = vmax.f32 %v3267_v36, 0.0  ;;  %v1559_v55 = vmax.f32 %v3273_v17, 0.0  ;;  %v1560_v11 = vmax.f32 %v1540_v60, 0.0  ;;  %v1561_v41 = vmax.f32 %v1541_v33, 0.0 }
 0x41c   : > { %1571 = vst [vmem:[%s1570_s24] sm:$0xff] %v1554_v3  ;;  %v1562_v22 = vmax.f32 %v3270_v32, 0.0  ;;  %v1563_v4 = vmax.f32 %v3276_v25, 0.0  ;;  %v1564_v24 = vmax.f32 %v1544_v49, 0.0  ;;  %v1565_v31 = vmax.f32 %v3279_v14, 0.0 }
 0x41d   : > { %1572 = vst [vmem:[%s1570_s24 + $0x8] sm:$0xff] %v1555_v0  ;;  %v1566_v27 = vmax.f32 %v3282_v44, 0.0  ;;  %v1567_v39 = vmax.f32 %v1547_v9, 0.0  ;;  %v1568_v10 = vmax.f32 %v3285_v18, 0.0  ;;  %v1569_v15 = vmax.f32 %v3288_v12, 0.0 }
 0x41e   : > { %1573 = vst [vmem:[%s1570_s24 + $0x10] sm:$0xff] %v1556_v20 }
 0x41f   : > { %1574 = vst [vmem:[%s1570_s24 + $0x18] sm:$0xff] %v1557_v16 }
 0x420   : > { %1575 = vst [vmem:[%s1570_s24 + $0x20] sm:$0xff] %v1558_v61 }
 0x421   : > { %1576 = vst [vmem:[%s1570_s24 + $0x28] sm:$0xff] %v1559_v55 }
 0x422   : > { %1577 = vst [vmem:[%s1570_s24 + $0x30] sm:$0xff] %v1560_v11 }
 0x423   : > { %1578 = vst [vmem:[%s1570_s24 + $0x38] sm:$0xff] %v1561_v41 }
 0x424   : > { %1579 = vst [vmem:[%s1570_s24 + $0x40] sm:$0xff] %v1562_v22 }
 0x425   : > { %1580 = vst [vmem:[%s1570_s24 + $0x48] sm:$0xff] %v1563_v4 }
 0x426   : > { %1581 = vst [vmem:[%s1570_s24 + $0x50] sm:$0xff] %v1564_v24 }
 0x427   : > { %1582 = vst [vmem:[%s1570_s24 + $0x58] sm:$0xff] %v1565_v31 }
 0x428   : > { %1583 = vst [vmem:[%s1570_s24 + $0x60] sm:$0xff] %v1566_v27 }
 0x429   : > { %1584 = vst [vmem:[%s1570_s24 + $0x68] sm:$0xff] %v1567_v39 }
 0x42a   : > { %1585 = vst [vmem:[%s1570_s24 + $0x70] sm:$0xff] %v1568_v10 }
 0x42b   : > { %1586 = vst [vmem:[%s1570_s24 + $0x78] sm:$0xff] %v1569_v15 }
 0x42c PF: > { %p1840_p6 = scmp.ne.s32.totalorder %s2473_s25, 1 }
 0x42e   : > { %1590 = sbr.rel (%p1840_p6) target bundleno = 1105 (0x451), region = 77 }
 0x433   : > { %1591 = vst [vmem:[#allocation5] sm:$0xff] %v3248_v5 }
 0x434   : > { %1592 = vst [vmem:[#allocation5 + $0x8] sm:$0xff] %v3256_v62 }
 0x435   : > { %1593 = vst [vmem:[#allocation5 + $0x10] sm:$0xff] %v3259_v40 }
 0x436   : > { %1594 = vst [vmem:[#allocation5 + $0x18] sm:$0xff] %v3262_v26 }
 0x437   : > { %1595 = vst [vmem:[#allocation5 + $0x20] sm:$0xff] %v3267_v36 }
 0x438   : > { %1596 = vst [vmem:[#allocation5 + $0x28] sm:$0xff] %v3273_v17 }
 0x439   : > { %1597 = vst [vmem:[#allocation5 + $0x30] sm:$0xff] %v1540_v60 }
 0x43a   : > { %1598 = vst [vmem:[#allocation5 + $0x38] sm:$0xff] %v1541_v33 }
 0x43b   : > { %1599 = vst [vmem:[#allocation5 + $0x40] sm:$0xff] %v3270_v32 }
 0x43c   : > { %1600 = vst [vmem:[#allocation5 + $0x48] sm:$0xff] %v3276_v25 }
 0x43d   : > { %1601 = vst [vmem:[#allocation5 + $0x50] sm:$0xff] %v1544_v49 }
 0x43e   : > { %1602 = vst [vmem:[#allocation5 + $0x58] sm:$0xff] %v3279_v14 }
 0x43f   : > { %1603 = vst [vmem:[#allocation5 + $0x60] sm:$0xff] %v3282_v44 }
 0x440   : > { %1604 = vst [vmem:[#allocation5 + $0x68] sm:$0xff] %v1547_v9 }
 0x441   : > { %1605 = vst [vmem:[#allocation5 + $0x70] sm:$0xff] %v3285_v18 }
 0x442   : > { %1606 = vst [vmem:[#allocation5 + $0x78] sm:$0xff] %v3288_v12 }
 0x443   : > { %s1607_s8 = scalar_lea.hbm %s3364_s6, %s2728_s17  ;;  %s2494_s9 = smov [#allocation5]  }
 0x444   : > { %s1615_s12 = sshll.u32 %s2494_s9, 4  ;;  %s1617_s19 = sshll.u32 %s1607_s8, 4  ;;  %s1616_s12 = int_to_ptr.vmem [resolvable:$true] %s1615_s12  ;;  %s1618_s19 = int_to_ptr.hbm [resolvable:$true] %s1617_s19 }
 0x445   : > { %s2395_s11 = sshra.s32 %s1618_s19, 4  ;;  %s2399_s15 = scalar_lea.hbm %s3364_s6, 256  ;;  %s2396_s11 = int_to_ptr.hbm [resolvable:$true] %s2395_s11 }
 0x446   : > { %s2397_s10 = scalar_lea.hbm %s2396_s11, 128  ;;  %p2400_p8 = scmp.lt.s32.totalorder %s2396_s11, %s3364_s6 }
 0x447   : > { %p2398_p7 = scmp.ne.s32.totalorder %s2396_s11, %s2397_s10  ;;  %p2401_p9 = scmp.lt.s32.totalorder %s2399_s15, %s2397_s10 }
 0x449   : > { %p2402_p10 = por %p2401_p9, %p2400_p8 }
 0x44b   : > { %p2403_p11 = pnand %p2402_p10, %p2398_p7 }
 0x44d   : > { %2406 = shalt.err (!%p2403_p11)  }
 0x44e   : > { %1620 = dma.vmem_to_hbm [thread:$0]  %s1616_s12, 2048, %s1618_s19, [#allocation18] }
 0x44f   : > { %2453 = dma.done.wait [#allocation18], 2048 }
 0x450   : > { %2454 = vsyncadd [#allocation18], 4294965248 }
 0x451 PF: > { %s23_s28 = sadd.s32 1, %s2485_s28   ;;  %s3418_s16 = sld [smem:[#allocation26_spill]] }
 0x452   : > { %p20_p12 = scmp.ge.s32.totalorder %s23_s28, 5   ;;  %s3419_s23 = sld [smem:[#allocation30_spill]] }
 0x453   : > { %s3420_s24 = sld [smem:[#allocation27_spill]]  ;;  %s3423_s21 = smov %s2461_s22 }
 0x454   : > { %s3421_s26 = sld [smem:[#allocation28_spill]]  ;;  %s3425_s25 = smov %s2481_s27 }
 0x455   : > { %s3422_s17 = sld [smem:[#allocation29_spill]] }
 0x457   : > { %s3424_s22 = smov %s3418_s16  ;;  %22 = sbr.rel (!%p20_p12) target bundleno = 11 (0xb), region = 125 }
 0x45b   : > { %s3426_s27 = smov %s3422_s17 }
 0x45c   :  { %1624 = vsyncpa [#allocation7], 1 }
 0x45d   :  { %1626 = vsyncpa [#allocation7 + $0x1], 1 }
 0x45e   :  { %1627 = vsyncpa [#allocation9], 1 }
 0x45f   :  { %1629 = vsyncpa [#allocation9 + $0x1], 1 }
 0x460   :  { %1630 = vsyncpa [#allocation12], 1 }

</bundles_post_ra>
